<compile_context>
chip_gen: v6e
topology: v6e:2x2x1
jax: 0.10.0
libtpu: 0.0.40
codegen_flags: <defaults>
</compile_context>

<pallas_src>
import jax
import jax.numpy as jnp
from jax import lax
from jax.experimental import pallas as pl
from jax.experimental.pallas import tpu as pltpu


def _gate_update(gates, c):
    """PyTorch LSTM gate math. gates: (B, 4H) pre-activation, c: (B, H)."""
    H = c.shape[-1]
    i = jax.nn.sigmoid(gates[:, 0 * H:1 * H])
    f = jax.nn.sigmoid(gates[:, 1 * H:2 * H])
    g = jnp.tanh(gates[:, 2 * H:3 * H])
    o = jax.nn.sigmoid(gates[:, 3 * H:4 * H])
    c_new = f * c + i * g
    h_new = o * jnp.tanh(c_new)
    return h_new, c_new


def lstm_kernel(x_ref,
                wih0_ref, whh0_ref, b0_ref,
                wih1_ref, whh1_ref, b1_ref,
                wd_ref, bd_ref,
                out_ref,
                gate_sc, h_sc):
    T, B, D = x_ref.shape
    H = whh0_ref.shape[0]
    zeros = jnp.zeros((B, H), jnp.float32)

    # --- Pass 1 (hoisted): layer-0 input projection for ALL timesteps as one
    #     (T*B, D) @ (D, 4H) matmul.
    x_flat = x_ref[...].reshape(T * B, D)
    gate_sc[...] = (
        jnp.dot(x_flat, wih0_ref[...], preferred_element_type=jnp.float32)
        + b0_ref[...]
    ).reshape(T, B, 4 * H)

    # --- Pass 2 (recurrent): layer 0 — only h @ W_hh0 per step.
    whh0 = whh0_ref[...]

    def l0_body(t, carry):
        h, c = carry
        g = gate_sc[t] + jnp.dot(h, whh0, preferred_element_type=jnp.float32)
        h, c = _gate_update(g, c)
        h_sc[t] = h
        return (h, c)

    lax.fori_loop(0, T, l0_body, (zeros, zeros), unroll=True)

    # --- Pass 3 (hoisted): layer-1 input projection over the whole layer-0 output
    #     as one (T*B, H) @ (H, 4H) matmul.  Reuses gate_sc.
    h1_flat = h_sc[...].reshape(T * B, H)
    gate_sc[...] = (
        jnp.dot(h1_flat, wih1_ref[...], preferred_element_type=jnp.float32)
        + b1_ref[...]
    ).reshape(T, B, 4 * H)

    # --- Pass 4 (recurrent): layer 1 — only h @ W_hh1 per step.  Reuses h_sc.
    whh1 = whh1_ref[...]

    def l1_body(t, carry):
        h, c = carry
        g = gate_sc[t] + jnp.dot(h, whh1, preferred_element_type=jnp.float32)
        h, c = _gate_update(g, c)
        h_sc[t] = h
        return (h, c)

    lax.fori_loop(0, T, l1_body, (zeros, zeros), unroll=True)

    # --- Pass 5 (hoisted): final Linear over the whole sequence as one
    #     (T*B, H) @ (H, C) matmul; one contiguous slab write to the output.
    h2_flat = h_sc[...].reshape(T * B, H)
    y = jnp.dot(h2_flat, wd_ref[...], preferred_element_type=jnp.float32) + bd_ref[...]
    out_ref[...] = y.reshape(T, B, -1).astype(out_ref.dtype)


@jax.jit
def lstm_forward(x, params):
    """x: (B, T, D_in) batch-first, like the PyTorch module. Returns (B, T, C)."""
    (wih0_t, whh0_t, b0, wih1_t, whh1_t, b1, wd_t, bd) = params
    B, T, D = x.shape
    H = whh0_t.shape[0]
    C = wd_t.shape[1]

    # Pad the batch (sublane) dim to a full f32 tile of 8 rows.
    B_pad = max(8, -(-B // 8) * 8)
    x_tm = jnp.transpose(x, (1, 0, 2))                        # (T, B, D) time-major
    if B_pad != B:
        x_tm = jnp.pad(x_tm, ((0, 0), (0, B_pad - B), (0, 0)))

    full = lambda a: pl.BlockSpec(a.shape, lambda i: (0,) * a.ndim)

    out_tm = pl.pallas_call(
        lstm_kernel,
        out_shape=jax.ShapeDtypeStruct((T, B_pad, C), x.dtype),
        grid_spec=pltpu.PrefetchScalarGridSpec(
            num_scalar_prefetch=0,
            grid=(1,),                    # whole sequence in one kernel invocation
            in_specs=[
                pl.BlockSpec((T, B_pad, D), lambda i: (0, 0, 0)),   # x (time-major)
                full(wih0_t), full(whh0_t), full(b0),
                full(wih1_t), full(whh1_t), full(b1),
                full(wd_t), full(bd),
            ],
            out_specs=pl.BlockSpec((T, B_pad, C), lambda i: (0, 0, 0)),
            scratch_shapes=[
                pltpu.VMEM((T, B_pad, 4 * H), jnp.float32),   # gate slab (reused L0 / L1)
                pltpu.VMEM((T, B_pad, H), jnp.float32),       # hidden slab (reused h1 / h2)
            ],
        ),
        compiler_params=pltpu.CompilerParams(
            dimension_semantics=("arbitrary",),
        ),
    )(x_tm, wih0_t, whh0_t, b0, wih1_t, whh1_t, b1, wd_t, bd)

    return jnp.transpose(out_tm[:, :B, :], (1, 0, 2))          # back to (B, T, C)


def init_params(key, input_size, hidden_size, num_classes):
    """Deterministic init mirroring PyTorch parameter shapes (stored pre-transposed)."""
    H = hidden_size
    k = 1.0 / jnp.sqrt(jnp.float32(H))
    keys = jax.random.split(key, 10)
    u = lambda kk, shape: jax.random.uniform(kk, shape, jnp.float32, -k, k)

    # Layer 0: weight_ih_l0 (4H, D), weight_hh_l0 (4H, H), biases (4H,)
    w_ih0 = u(keys[0], (4 * H, input_size))
    w_hh0 = u(keys[1], (4 * H, H))
    b0 = u(keys[2], (4 * H,)) + u(keys[3], (4 * H,))     # b_ih + b_hh
    # Layer 1: weight_ih_l1 (4H, H), weight_hh_l1 (4H, H)
    w_ih1 = u(keys[4], (4 * H, H))
    w_hh1 = u(keys[5], (4 * H, H))
    b1 = u(keys[6], (4 * H,)) + u(keys[7], (4 * H,))
    # Dense: (num_classes, H), (num_classes,)
    w_d = u(keys[8], (num_classes, H))
    b_d = u(keys[9], (num_classes,))

    return (w_ih0.T, w_hh0.T, b0.reshape(1, 4 * H),
            w_ih1.T, w_hh1.T, b1.reshape(1, 4 * H),
            w_d.T, b_d.reshape(1, num_classes))


def reference_forward(x, params):
    """Pure-JAX reference (PyTorch LSTM semantics, unfused math) for verification."""
    (wih0_t, whh0_t, b0, wih1_t, whh1_t, b1, wd_t, bd) = params
    B, T, _ = x.shape
    H = whh0_t.shape[0]

    def cell(x_t, h, c, w_ih_t, w_hh_t, b):
        gates = jnp.dot(x_t, w_ih_t) + jnp.dot(h, w_hh_t) + b
        i = jax.nn.sigmoid(gates[:, 0 * H:1 * H])
        f = jax.nn.sigmoid(gates[:, 1 * H:2 * H])
        g = jnp.tanh(gates[:, 2 * H:3 * H])
        o = jax.nn.sigmoid(gates[:, 3 * H:4 * H])
        c_new = f * c + i * g
        return o * jnp.tanh(c_new), c_new

    def step(carry, x_t):
        h1, c1, h2, c2 = carry
        h1, c1 = cell(x_t, h1, c1, wih0_t, whh0_t, b0)
        h2, c2 = cell(h1, h2, c2, wih1_t, whh1_t, b1)
        y = jnp.dot(h2, wd_t) + bd
        return (h1, c1, h2, c2), y

    zeros = jnp.zeros((B, H), jnp.float32)
    _, ys = lax.scan(step, (zeros, zeros, zeros, zeros),
                     jnp.transpose(x, (1, 0, 2)))
    return jnp.transpose(ys, (1, 0, 2))


if __name__ == "__main__":
    B, T, D_IN, HIDDEN, NUM_CLASSES = 2, 8, 16, 32, 4

    key = jax.random.PRNGKey(0)
    k_params, k_x = jax.random.split(key)
    params = init_params(k_params, D_IN, HIDDEN, NUM_CLASSES)
    x = jax.random.normal(k_x, (B, T, D_IN), jnp.float32)

    out = lstm_forward(x, params)
    out = jax.block_until_ready(out)

    ref = reference_forward(x, params)
    assert out.shape == (B, T, NUM_CLASSES)
    assert jnp.allclose(out, ref, atol=1e-5, rtol=1e-5)

    print("KERNEL_OK")
</pallas_src>

<mosaic_0001>
module attributes {stable_mosaic.version = 11 : i64} {
  func.func @lstm_kernel(%arg0: i32, %arg1: memref<8x8x16xf32, #tpu.memory_space<vmem>>, %arg2: memref<16x128xf32, #tpu.memory_space<vmem>>, %arg3: memref<32x128xf32, #tpu.memory_space<vmem>>, %arg4: memref<1x128xf32, #tpu.memory_space<vmem>>, %arg5: memref<32x128xf32, #tpu.memory_space<vmem>>, %arg6: memref<32x128xf32, #tpu.memory_space<vmem>>, %arg7: memref<1x128xf32, #tpu.memory_space<vmem>>, %arg8: memref<32x4xf32, #tpu.memory_space<vmem>>, %arg9: memref<1x4xf32, #tpu.memory_space<vmem>>, %arg10: memref<8x8x4xf32, #tpu.memory_space<vmem>>, %arg11: memref<8x8x128xf32, #tpu.memory_space<vmem>>, %arg12: memref<8x8x32xf32, #tpu.memory_space<vmem>>) attributes {dimension_semantics = [#tpu.dimension_semantics<arbitrary>], iteration_bounds = array<i64: 1>, scalar_prefetch = 0 : i64, scratch_operands = 2 : i64, tpu.core_type = #tpu.core_type<tc>, window_params = [{pipeline_mode = #tpu.pipeline_mode<synchronous>, transform_indices = @transform_0, window_bounds = array<i64: 8, 8, 16>}, {pipeline_mode = #tpu.pipeline_mode<synchronous>, transform_indices = @transform_1, window_bounds = array<i64: 16, 128>}, {pipeline_mode = #tpu.pipeline_mode<synchronous>, transform_indices = @transform_2, window_bounds = array<i64: 32, 128>}, {pipeline_mode = #tpu.pipeline_mode<synchronous>, transform_indices = @transform_3, window_bounds = array<i64: 1, 128>}, {pipeline_mode = #tpu.pipeline_mode<synchronous>, transform_indices = @transform_4, window_bounds = array<i64: 32, 128>}, {pipeline_mode = #tpu.pipeline_mode<synchronous>, transform_indices = @transform_5, window_bounds = array<i64: 32, 128>}, {pipeline_mode = #tpu.pipeline_mode<synchronous>, transform_indices = @transform_6, window_bounds = array<i64: 1, 128>}, {pipeline_mode = #tpu.pipeline_mode<synchronous>, transform_indices = @transform_7, window_bounds = array<i64: 32, 4>}, {pipeline_mode = #tpu.pipeline_mode<synchronous>, transform_indices = @transform_8, window_bounds = array<i64: 1, 4>}, {pipeline_mode = #tpu.pipeline_mode<synchronous>, transform_indices = @transform_9, window_bounds = array<i64: 8, 8, 4>}]} {
    %cst = arith.constant 0.000000e+00 : f32
    %0 = vector.broadcast %cst : f32 to vector<8x32xf32>
    %c0 = arith.constant 0 : index
    %c0_0 = arith.constant 0 : index
    %c0_1 = arith.constant 0 : index
    %1 = vector.load %arg1[%c0, %c0_0, %c0_1] : memref<8x8x16xf32, #tpu.memory_space<vmem>>, vector<8x8x16xf32>
    %2 = vector.shape_cast %1 : vector<8x8x16xf32> to vector<64x16xf32>
    %c0_2 = arith.constant 0 : index
    %c0_3 = arith.constant 0 : index
    %3 = vector.load %arg2[%c0_2, %c0_3] : memref<16x128xf32, #tpu.memory_space<vmem>>, vector<16x128xf32>
    %cst_4 = arith.constant dense<0.000000e+00> : vector<64x128xf32>
    %4 = tpu.matmul %2, %3, %cst_4 {dimension_numbers = #tpu.dot_dimension_numbers<[1], [0], [0], [1], [0, 0, 1, 1], [], []>} : vector<64x16xf32>, vector<16x128xf32>, vector<64x128xf32> -> vector<64x128xf32>
    %c0_5 = arith.constant 0 : index
    %c0_6 = arith.constant 0 : index
    %5 = vector.load %arg4[%c0_5, %c0_6] : memref<1x128xf32, #tpu.memory_space<vmem>>, vector<1x128xf32>
    %6 = vector.broadcast %5 : vector<1x128xf32> to vector<64x128xf32>
    %7 = arith.addf %4, %6 : vector<64x128xf32>
    %8 = vector.shape_cast %7 : vector<64x128xf32> to vector<8x8x128xf32>
    %c0_7 = arith.constant 0 : index
    %c0_8 = arith.constant 0 : index
    %c0_9 = arith.constant 0 : index
    %9 = vector.load %arg11[%c0_7, %c0_8, %c0_9] : memref<8x8x128xf32, #tpu.memory_space<vmem>>, vector<8x8x128xf32>
    tpu.vector_store %arg11[%c0_7, %c0_8, %c0_9], %8 {strides = array<i32>} : memref<8x8x128xf32, #tpu.memory_space<vmem>>, vector<8x8x128xf32>,
    %c0_10 = arith.constant 0 : index
    %c0_11 = arith.constant 0 : index
    %10 = vector.load %arg3[%c0_10, %c0_11] : memref<32x128xf32, #tpu.memory_space<vmem>>, vector<32x128xf32>
    %c0_i32 = arith.constant 0 : i32
    %11 = arith.index_cast %c0_i32 : i32 to index
    %c0_12 = arith.constant 0 : index
    %c0_13 = arith.constant 0 : index
    %12 = vector.load %arg11[%11, %c0_12, %c0_13] : memref<8x8x128xf32, #tpu.memory_space<vmem>>, vector<1x8x128xf32>
    %13 = vector.shape_cast %12 : vector<1x8x128xf32> to vector<8x128xf32>
    %cst_14 = arith.constant dense<0.000000e+00> : vector<8x128xf32>
    %14 = tpu.matmul %0, %10, %cst_14 {dimension_numbers = #tpu.dot_dimension_numbers<[1], [0], [0], [1], [0, 0, 1, 1], [], []>} : vector<8x32xf32>, vector<32x128xf32>, vector<8x128xf32> -> vector<8x128xf32>
    %15 = arith.addf %13, %14 : vector<8x128xf32>
    %16 = vector.extract_strided_slice %15 {offsets = [0, 0], sizes = [8, 32], strides = [1, 1]} : vector<8x128xf32> to vector<8x32xf32>
    %17 = arith.negf %16 : vector<8x32xf32>
    %18 = math.exp %17 : vector<8x32xf32>
    %cst_15 = arith.constant 1.000000e+00 : f32
    %19 = vector.broadcast %cst_15 : f32 to vector<8x32xf32>
    %20 = arith.addf %19, %18 : vector<8x32xf32>
    %21 = arith.divf %19, %20 : vector<8x32xf32>
    %22 = vector.extract_strided_slice %15 {offsets = [0, 32], sizes = [8, 32], strides = [1, 1]} : vector<8x128xf32> to vector<8x32xf32>
    %23 = arith.negf %22 : vector<8x32xf32>
    %24 = math.exp %23 : vector<8x32xf32>
    %cst_16 = arith.constant 1.000000e+00 : f32
    %25 = vector.broadcast %cst_16 : f32 to vector<8x32xf32>
    %26 = arith.addf %25, %24 : vector<8x32xf32>
    %27 = arith.divf %25, %26 : vector<8x32xf32>
    %28 = vector.extract_strided_slice %15 {offsets = [0, 64], sizes = [8, 32], strides = [1, 1]} : vector<8x128xf32> to vector<8x32xf32>
    %29 = math.tanh %28 : vector<8x32xf32>
    %30 = vector.extract_strided_slice %15 {offsets = [0, 96], sizes = [8, 32], strides = [1, 1]} : vector<8x128xf32> to vector<8x32xf32>
    %31 = arith.negf %30 : vector<8x32xf32>
    %32 = math.exp %31 : vector<8x32xf32>
    %cst_17 = arith.constant 1.000000e+00 : f32
    %33 = vector.broadcast %cst_17 : f32 to vector<8x32xf32>
    %34 = arith.addf %33, %32 : vector<8x32xf32>
    %35 = arith.divf %33, %34 : vector<8x32xf32>
    %36 = arith.mulf %27, %0 : vector<8x32xf32>
    %37 = arith.mulf %21, %29 : vector<8x32xf32>
    %38 = arith.addf %36, %37 : vector<8x32xf32>
    %39 = math.tanh %38 : vector<8x32xf32>
    %40 = arith.mulf %35, %39 : vector<8x32xf32>
    %41 = arith.index_cast %c0_i32 : i32 to index
    %c0_18 = arith.constant 0 : index
    %c0_19 = arith.constant 0 : index
    %42 = vector.load %arg12[%41, %c0_18, %c0_19] : memref<8x8x32xf32, #tpu.memory_space<vmem>>, vector<1x8x32xf32>
    %43 = vector.shape_cast %42 : vector<1x8x32xf32> to vector<8x32xf32>
    %44 = vector.shape_cast %40 : vector<8x32xf32> to vector<1x8x32xf32>
    tpu.vector_store %arg12[%41, %c0_18, %c0_19], %44 {strides = array<i32>} : memref<8x8x32xf32, #tpu.memory_space<vmem>>, vector<1x8x32xf32>,
    %c1_i32 = arith.constant 1 : i32
    %45 = arith.index_cast %c1_i32 : i32 to index
    %c0_20 = arith.constant 0 : index
    %c0_21 = arith.constant 0 : index
    %46 = vector.load %arg11[%45, %c0_20, %c0_21] : memref<8x8x128xf32, #tpu.memory_space<vmem>>, vector<1x8x128xf32>
    %47 = vector.shape_cast %46 : vector<1x8x128xf32> to vector<8x128xf32>
    %cst_22 = arith.constant dense<0.000000e+00> : vector<8x128xf32>
    %48 = tpu.matmul %40, %10, %cst_22 {dimension_numbers = #tpu.dot_dimension_numbers<[1], [0], [0], [1], [0, 0, 1, 1], [], []>} : vector<8x32xf32>, vector<32x128xf32>, vector<8x128xf32> -> vector<8x128xf32>
    %49 = arith.addf %47, %48 : vector<8x128xf32>
    %50 = vector.extract_strided_slice %49 {offsets = [0, 0], sizes = [8, 32], strides = [1, 1]} : vector<8x128xf32> to vector<8x32xf32>
    %51 = arith.negf %50 : vector<8x32xf32>
    %52 = math.exp %51 : vector<8x32xf32>
    %cst_23 = arith.constant 1.000000e+00 : f32
    %53 = vector.broadcast %cst_23 : f32 to vector<8x32xf32>
    %54 = arith.addf %53, %52 : vector<8x32xf32>
    %55 = arith.divf %53, %54 : vector<8x32xf32>
    %56 = vector.extract_strided_slice %49 {offsets = [0, 32], sizes = [8, 32], strides = [1, 1]} : vector<8x128xf32> to vector<8x32xf32>
    %57 = arith.negf %56 : vector<8x32xf32>
    %58 = math.exp %57 : vector<8x32xf32>
    %cst_24 = arith.constant 1.000000e+00 : f32
    %59 = vector.broadcast %cst_24 : f32 to vector<8x32xf32>
    %60 = arith.addf %59, %58 : vector<8x32xf32>
    %61 = arith.divf %59, %60 : vector<8x32xf32>
    %62 = vector.extract_strided_slice %49 {offsets = [0, 64], sizes = [8, 32], strides = [1, 1]} : vector<8x128xf32> to vector<8x32xf32>
    %63 = math.tanh %62 : vector<8x32xf32>
    %64 = vector.extract_strided_slice %49 {offsets = [0, 96], sizes = [8, 32], strides = [1, 1]} : vector<8x128xf32> to vector<8x32xf32>
    %65 = arith.negf %64 : vector<8x32xf32>
    %66 = math.exp %65 : vector<8x32xf32>
    %cst_25 = arith.constant 1.000000e+00 : f32
    %67 = vector.broadcast %cst_25 : f32 to vector<8x32xf32>
    %68 = arith.addf %67, %66 : vector<8x32xf32>
    %69 = arith.divf %67, %68 : vector<8x32xf32>
    %70 = arith.mulf %61, %38 : vector<8x32xf32>
    %71 = arith.mulf %55, %63 : vector<8x32xf32>
    %72 = arith.addf %70, %71 : vector<8x32xf32>
    %73 = math.tanh %72 : vector<8x32xf32>
    %74 = arith.mulf %69, %73 : vector<8x32xf32>
    %75 = arith.index_cast %c1_i32 : i32 to index
    %c0_26 = arith.constant 0 : index
    %c0_27 = arith.constant 0 : index
    %76 = vector.load %arg12[%75, %c0_26, %c0_27] : memref<8x8x32xf32, #tpu.memory_space<vmem>>, vector<1x8x32xf32>
    %77 = vector.shape_cast %76 : vector<1x8x32xf32> to vector<8x32xf32>
    %78 = vector.shape_cast %74 : vector<8x32xf32> to vector<1x8x32xf32>
    tpu.vector_store %arg12[%75, %c0_26, %c0_27], %78 {strides = array<i32>} : memref<8x8x32xf32, #tpu.memory_space<vmem>>, vector<1x8x32xf32>,
    %c2_i32 = arith.constant 2 : i32
    %79 = arith.index_cast %c2_i32 : i32 to index
    %c0_28 = arith.constant 0 : index
    %c0_29 = arith.constant 0 : index
    %80 = vector.load %arg11[%79, %c0_28, %c0_29] : memref<8x8x128xf32, #tpu.memory_space<vmem>>, vector<1x8x128xf32>
    %81 = vector.shape_cast %80 : vector<1x8x128xf32> to vector<8x128xf32>
    %cst_30 = arith.constant dense<0.000000e+00> : vector<8x128xf32>
    %82 = tpu.matmul %74, %10, %cst_30 {dimension_numbers = #tpu.dot_dimension_numbers<[1], [0], [0], [1], [0, 0, 1, 1], [], []>} : vector<8x32xf32>, vector<32x128xf32>, vector<8x128xf32> -> vector<8x128xf32>
    %83 = arith.addf %81, %82 : vector<8x128xf32>
    %84 = vector.extract_strided_slice %83 {offsets = [0, 0], sizes = [8, 32], strides = [1, 1]} : vector<8x128xf32> to vector<8x32xf32>
    %85 = arith.negf %84 : vector<8x32xf32>
    %86 = math.exp %85 : vector<8x32xf32>
    %cst_31 = arith.constant 1.000000e+00 : f32
    %87 = vector.broadcast %cst_31 : f32 to vector<8x32xf32>
    %88 = arith.addf %87, %86 : vector<8x32xf32>
    %89 = arith.divf %87, %88 : vector<8x32xf32>
    %90 = vector.extract_strided_slice %83 {offsets = [0, 32], sizes = [8, 32], strides = [1, 1]} : vector<8x128xf32> to vector<8x32xf32>
    %91 = arith.negf %90 : vector<8x32xf32>
    %92 = math.exp %91 : vector<8x32xf32>
    %cst_32 = arith.constant 1.000000e+00 : f32
    %93 = vector.broadcast %cst_32 : f32 to vector<8x32xf32>
    %94 = arith.addf %93, %92 : vector<8x32xf32>
    %95 = arith.divf %93, %94 : vector<8x32xf32>
    %96 = vector.extract_strided_slice %83 {offsets = [0, 64], sizes = [8, 32], strides = [1, 1]} : vector<8x128xf32> to vector<8x32xf32>
    %97 = math.tanh %96 : vector<8x32xf32>
    %98 = vector.extract_strided_slice %83 {offsets = [0, 96], sizes = [8, 32], strides = [1, 1]} : vector<8x128xf32> to vector<8x32xf32>
    %99 = arith.negf %98 : vector<8x32xf32>
    %100 = math.exp %99 : vector<8x32xf32>
    %cst_33 = arith.constant 1.000000e+00 : f32
    %101 = vector.broadcast %cst_33 : f32 to vector<8x32xf32>
    %102 = arith.addf %101, %100 : vector<8x32xf32>
    %103 = arith.divf %101, %102 : vector<8x32xf32>
    %104 = arith.mulf %95, %72 : vector<8x32xf32>
    %105 = arith.mulf %89, %97 : vector<8x32xf32>
    %106 = arith.addf %104, %105 : vector<8x32xf32>
    %107 = math.tanh %106 : vector<8x32xf32>
    %108 = arith.mulf %103, %107 : vector<8x32xf32>
    %109 = arith.index_cast %c2_i32 : i32 to index
    %c0_34 = arith.constant 0 : index
    %c0_35 = arith.constant 0 : index
    %110 = vector.load %arg12[%109, %c0_34, %c0_35] : memref<8x8x32xf32, #tpu.memory_space<vmem>>, vector<1x8x32xf32>
    %111 = vector.shape_cast %110 : vector<1x8x32xf32> to vector<8x32xf32>
    %112 = vector.shape_cast %108 : vector<8x32xf32> to vector<1x8x32xf32>
    tpu.vector_store %arg12[%109, %c0_34, %c0_35], %112 {strides = array<i32>} : memref<8x8x32xf32, #tpu.memory_space<vmem>>, vector<1x8x32xf32>,
    %c3_i32 = arith.constant 3 : i32
    %113 = arith.index_cast %c3_i32 : i32 to index
    %c0_36 = arith.constant 0 : index
    %c0_37 = arith.constant 0 : index
    %114 = vector.load %arg11[%113, %c0_36, %c0_37] : memref<8x8x128xf32, #tpu.memory_space<vmem>>, vector<1x8x128xf32>
    %115 = vector.shape_cast %114 : vector<1x8x128xf32> to vector<8x128xf32>
    %cst_38 = arith.constant dense<0.000000e+00> : vector<8x128xf32>
    %116 = tpu.matmul %108, %10, %cst_38 {dimension_numbers = #tpu.dot_dimension_numbers<[1], [0], [0], [1], [0, 0, 1, 1], [], []>} : vector<8x32xf32>, vector<32x128xf32>, vector<8x128xf32> -> vector<8x128xf32>
    %117 = arith.addf %115, %116 : vector<8x128xf32>
    %118 = vector.extract_strided_slice %117 {offsets = [0, 0], sizes = [8, 32], strides = [1, 1]} : vector<8x128xf32> to vector<8x32xf32>
    %119 = arith.negf %118 : vector<8x32xf32>
    %120 = math.exp %119 : vector<8x32xf32>
    %cst_39 = arith.constant 1.000000e+00 : f32
    %121 = vector.broadcast %cst_39 : f32 to vector<8x32xf32>
    %122 = arith.addf %121, %120 : vector<8x32xf32>
    %123 = arith.divf %121, %122 : vector<8x32xf32>
    %124 = vector.extract_strided_slice %117 {offsets = [0, 32], sizes = [8, 32], strides = [1, 1]} : vector<8x128xf32> to vector<8x32xf32>
    %125 = arith.negf %124 : vector<8x32xf32>
    %126 = math.exp %125 : vector<8x32xf32>
    %cst_40 = arith.constant 1.000000e+00 : f32
    %127 = vector.broadcast %cst_40 : f32 to vector<8x32xf32>
    %128 = arith.addf %127, %126 : vector<8x32xf32>
    %129 = arith.divf %127, %128 : vector<8x32xf32>
    %130 = vector.extract_strided_slice %117 {offsets = [0, 64], sizes = [8, 32], strides = [1, 1]} : vector<8x128xf32> to vector<8x32xf32>
    %131 = math.tanh %130 : vector<8x32xf32>
    %132 = vector.extract_strided_slice %117 {offsets = [0, 96], sizes = [8, 32], strides = [1, 1]} : vector<8x128xf32> to vector<8x32xf32>
    %133 = arith.negf %132 : vector<8x32xf32>
    %134 = math.exp %133 : vector<8x32xf32>
    %cst_41 = arith.constant 1.000000e+00 : f32
    %135 = vector.broadcast %cst_41 : f32 to vector<8x32xf32>
    %136 = arith.addf %135, %134 : vector<8x32xf32>
    %137 = arith.divf %135, %136 : vector<8x32xf32>
    %138 = arith.mulf %129, %106 : vector<8x32xf32>
    %139 = arith.mulf %123, %131 : vector<8x32xf32>
    %140 = arith.addf %138, %139 : vector<8x32xf32>
    %141 = math.tanh %140 : vector<8x32xf32>
    %142 = arith.mulf %137, %141 : vector<8x32xf32>
    %143 = arith.index_cast %c3_i32 : i32 to index
    %c0_42 = arith.constant 0 : index
    %c0_43 = arith.constant 0 : index
    %144 = vector.load %arg12[%143, %c0_42, %c0_43] : memref<8x8x32xf32, #tpu.memory_space<vmem>>, vector<1x8x32xf32>
    %145 = vector.shape_cast %144 : vector<1x8x32xf32> to vector<8x32xf32>
    %146 = vector.shape_cast %142 : vector<8x32xf32> to vector<1x8x32xf32>
    tpu.vector_store %arg12[%143, %c0_42, %c0_43], %146 {strides = array<i32>} : memref<8x8x32xf32, #tpu.memory_space<vmem>>, vector<1x8x32xf32>,
    %c4_i32 = arith.constant 4 : i32
    %147 = arith.index_cast %c4_i32 : i32 to index
    %c0_44 = arith.constant 0 : index
    %c0_45 = arith.constant 0 : index
    %148 = vector.load %arg11[%147, %c0_44, %c0_45] : memref<8x8x128xf32, #tpu.memory_space<vmem>>, vector<1x8x128xf32>
    %149 = vector.shape_cast %148 : vector<1x8x128xf32> to vector<8x128xf32>
    %cst_46 = arith.constant dense<0.000000e+00> : vector<8x128xf32>
    %150 = tpu.matmul %142, %10, %cst_46 {dimension_numbers = #tpu.dot_dimension_numbers<[1], [0], [0], [1], [0, 0, 1, 1], [], []>} : vector<8x32xf32>, vector<32x128xf32>, vector<8x128xf32> -> vector<8x128xf32>
    %151 = arith.addf %149, %150 : vector<8x128xf32>
    %152 = vector.extract_strided_slice %151 {offsets = [0, 0], sizes = [8, 32], strides = [1, 1]} : vector<8x128xf32> to vector<8x32xf32>
    %153 = arith.negf %152 : vector<8x32xf32>
    %154 = math.exp %153 : vector<8x32xf32>
    %cst_47 = arith.constant 1.000000e+00 : f32
    %155 = vector.broadcast %cst_47 : f32 to vector<8x32xf32>
    %156 = arith.addf %155, %154 : vector<8x32xf32>
    %157 = arith.divf %155, %156 : vector<8x32xf32>
    %158 = vector.extract_strided_slice %151 {offsets = [0, 32], sizes = [8, 32], strides = [1, 1]} : vector<8x128xf32> to vector<8x32xf32>
    %159 = arith.negf %158 : vector<8x32xf32>
    %160 = math.exp %159 : vector<8x32xf32>
    %cst_48 = arith.constant 1.000000e+00 : f32
    %161 = vector.broadcast %cst_48 : f32 to vector<8x32xf32>
    %162 = arith.addf %161, %160 : vector<8x32xf32>
    %163 = arith.divf %161, %162 : vector<8x32xf32>
    %164 = vector.extract_strided_slice %151 {offsets = [0, 64], sizes = [8, 32], strides = [1, 1]} : vector<8x128xf32> to vector<8x32xf32>
    %165 = math.tanh %164 : vector<8x32xf32>
    %166 = vector.extract_strided_slice %151 {offsets = [0, 96], sizes = [8, 32], strides = [1, 1]} : vector<8x128xf32> to vector<8x32xf32>
    %167 = arith.negf %166 : vector<8x32xf32>
    %168 = math.exp %167 : vector<8x32xf32>
    %cst_49 = arith.constant 1.000000e+00 : f32
    %169 = vector.broadcast %cst_49 : f32 to vector<8x32xf32>
    %170 = arith.addf %169, %168 : vector<8x32xf32>
    %171 = arith.divf %169, %170 : vector<8x32xf32>
    %172 = arith.mulf %163, %140 : vector<8x32xf32>
    %173 = arith.mulf %157, %165 : vector<8x32xf32>
    %174 = arith.addf %172, %173 : vector<8x32xf32>
    %175 = math.tanh %174 : vector<8x32xf32>
    %176 = arith.mulf %171, %175 : vector<8x32xf32>
    %177 = arith.index_cast %c4_i32 : i32 to index
    %c0_50 = arith.constant 0 : index
    %c0_51 = arith.constant 0 : index
    %178 = vector.load %arg12[%177, %c0_50, %c0_51] : memref<8x8x32xf32, #tpu.memory_space<vmem>>, vector<1x8x32xf32>
    %179 = vector.shape_cast %178 : vector<1x8x32xf32> to vector<8x32xf32>
    %180 = vector.shape_cast %176 : vector<8x32xf32> to vector<1x8x32xf32>
    tpu.vector_store %arg12[%177, %c0_50, %c0_51], %180 {strides = array<i32>} : memref<8x8x32xf32, #tpu.memory_space<vmem>>, vector<1x8x32xf32>,
    %c5_i32 = arith.constant 5 : i32
    %181 = arith.index_cast %c5_i32 : i32 to index
    %c0_52 = arith.constant 0 : index
    %c0_53 = arith.constant 0 : index
    %182 = vector.load %arg11[%181, %c0_52, %c0_53] : memref<8x8x128xf32, #tpu.memory_space<vmem>>, vector<1x8x128xf32>
    %183 = vector.shape_cast %182 : vector<1x8x128xf32> to vector<8x128xf32>
    %cst_54 = arith.constant dense<0.000000e+00> : vector<8x128xf32>
    %184 = tpu.matmul %176, %10, %cst_54 {dimension_numbers = #tpu.dot_dimension_numbers<[1], [0], [0], [1], [0, 0, 1, 1], [], []>} : vector<8x32xf32>, vector<32x128xf32>, vector<8x128xf32> -> vector<8x128xf32>
    %185 = arith.addf %183, %184 : vector<8x128xf32>
    %186 = vector.extract_strided_slice %185 {offsets = [0, 0], sizes = [8, 32], strides = [1, 1]} : vector<8x128xf32> to vector<8x32xf32>
    %187 = arith.negf %186 : vector<8x32xf32>
    %188 = math.exp %187 : vector<8x32xf32>
    %cst_55 = arith.constant 1.000000e+00 : f32
    %189 = vector.broadcast %cst_55 : f32 to vector<8x32xf32>
    %190 = arith.addf %189, %188 : vector<8x32xf32>
    %191 = arith.divf %189, %190 : vector<8x32xf32>
    %192 = vector.extract_strided_slice %185 {offsets = [0, 32], sizes = [8, 32], strides = [1, 1]} : vector<8x128xf32> to vector<8x32xf32>
    %193 = arith.negf %192 : vector<8x32xf32>
    %194 = math.exp %193 : vector<8x32xf32>
    %cst_56 = arith.constant 1.000000e+00 : f32
    %195 = vector.broadcast %cst_56 : f32 to vector<8x32xf32>
    %196 = arith.addf %195, %194 : vector<8x32xf32>
    %197 = arith.divf %195, %196 : vector<8x32xf32>
    %198 = vector.extract_strided_slice %185 {offsets = [0, 64], sizes = [8, 32], strides = [1, 1]} : vector<8x128xf32> to vector<8x32xf32>
    %199 = math.tanh %198 : vector<8x32xf32>
    %200 = vector.extract_strided_slice %185 {offsets = [0, 96], sizes = [8, 32], strides = [1, 1]} : vector<8x128xf32> to vector<8x32xf32>
    %201 = arith.negf %200 : vector<8x32xf32>
    %202 = math.exp %201 : vector<8x32xf32>
    %cst_57 = arith.constant 1.000000e+00 : f32
    %203 = vector.broadcast %cst_57 : f32 to vector<8x32xf32>
    %204 = arith.addf %203, %202 : vector<8x32xf32>
    %205 = arith.divf %203, %204 : vector<8x32xf32>
    %206 = arith.mulf %197, %174 : vector<8x32xf32>
    %207 = arith.mulf %191, %199 : vector<8x32xf32>
    %208 = arith.addf %206, %207 : vector<8x32xf32>
    %209 = math.tanh %208 : vector<8x32xf32>
    %210 = arith.mulf %205, %209 : vector<8x32xf32>
    %211 = arith.index_cast %c5_i32 : i32 to index
    %c0_58 = arith.constant 0 : index
    %c0_59 = arith.constant 0 : index
    %212 = vector.load %arg12[%211, %c0_58, %c0_59] : memref<8x8x32xf32, #tpu.memory_space<vmem>>, vector<1x8x32xf32>
    %213 = vector.shape_cast %212 : vector<1x8x32xf32> to vector<8x32xf32>
    %214 = vector.shape_cast %210 : vector<8x32xf32> to vector<1x8x32xf32>
    tpu.vector_store %arg12[%211, %c0_58, %c0_59], %214 {strides = array<i32>} : memref<8x8x32xf32, #tpu.memory_space<vmem>>, vector<1x8x32xf32>,
    %c6_i32 = arith.constant 6 : i32
    %215 = arith.index_cast %c6_i32 : i32 to index
    %c0_60 = arith.constant 0 : index
    %c0_61 = arith.constant 0 : index
    %216 = vector.load %arg11[%215, %c0_60, %c0_61] : memref<8x8x128xf32, #tpu.memory_space<vmem>>, vector<1x8x128xf32>
    %217 = vector.shape_cast %216 : vector<1x8x128xf32> to vector<8x128xf32>
    %cst_62 = arith.constant dense<0.000000e+00> : vector<8x128xf32>
    %218 = tpu.matmul %210, %10, %cst_62 {dimension_numbers = #tpu.dot_dimension_numbers<[1], [0], [0], [1], [0, 0, 1, 1], [], []>} : vector<8x32xf32>, vector<32x128xf32>, vector<8x128xf32> -> vector<8x128xf32>
    %219 = arith.addf %217, %218 : vector<8x128xf32>
    %220 = vector.extract_strided_slice %219 {offsets = [0, 0], sizes = [8, 32], strides = [1, 1]} : vector<8x128xf32> to vector<8x32xf32>
    %221 = arith.negf %220 : vector<8x32xf32>
    %222 = math.exp %221 : vector<8x32xf32>
    %cst_63 = arith.constant 1.000000e+00 : f32
    %223 = vector.broadcast %cst_63 : f32 to vector<8x32xf32>
    %224 = arith.addf %223, %222 : vector<8x32xf32>
    %225 = arith.divf %223, %224 : vector<8x32xf32>
    %226 = vector.extract_strided_slice %219 {offsets = [0, 32], sizes = [8, 32], strides = [1, 1]} : vector<8x128xf32> to vector<8x32xf32>
    %227 = arith.negf %226 : vector<8x32xf32>
    %228 = math.exp %227 : vector<8x32xf32>
    %cst_64 = arith.constant 1.000000e+00 : f32
    %229 = vector.broadcast %cst_64 : f32 to vector<8x32xf32>
    %230 = arith.addf %229, %228 : vector<8x32xf32>
    %231 = arith.divf %229, %230 : vector<8x32xf32>
    %232 = vector.extract_strided_slice %219 {offsets = [0, 64], sizes = [8, 32], strides = [1, 1]} : vector<8x128xf32> to vector<8x32xf32>
    %233 = math.tanh %232 : vector<8x32xf32>
    %234 = vector.extract_strided_slice %219 {offsets = [0, 96], sizes = [8, 32], strides = [1, 1]} : vector<8x128xf32> to vector<8x32xf32>
    %235 = arith.negf %234 : vector<8x32xf32>
    %236 = math.exp %235 : vector<8x32xf32>
    %cst_65 = arith.constant 1.000000e+00 : f32
    %237 = vector.broadcast %cst_65 : f32 to vector<8x32xf32>
    %238 = arith.addf %237, %236 : vector<8x32xf32>
    %239 = arith.divf %237, %238 : vector<8x32xf32>
    %240 = arith.mulf %231, %208 : vector<8x32xf32>
    %241 = arith.mulf %225, %233 : vector<8x32xf32>
    %242 = arith.addf %240, %241 : vector<8x32xf32>
    %243 = math.tanh %242 : vector<8x32xf32>
    %244 = arith.mulf %239, %243 : vector<8x32xf32>
    %245 = arith.index_cast %c6_i32 : i32 to index
    %c0_66 = arith.constant 0 : index
    %c0_67 = arith.constant 0 : index
    %246 = vector.load %arg12[%245, %c0_66, %c0_67] : memref<8x8x32xf32, #tpu.memory_space<vmem>>, vector<1x8x32xf32>
    %247 = vector.shape_cast %246 : vector<1x8x32xf32> to vector<8x32xf32>
    %248 = vector.shape_cast %244 : vector<8x32xf32> to vector<1x8x32xf32>
    tpu.vector_store %arg12[%245, %c0_66, %c0_67], %248 {strides = array<i32>} : memref<8x8x32xf32, #tpu.memory_space<vmem>>, vector<1x8x32xf32>,
    %c7_i32 = arith.constant 7 : i32
    %249 = arith.index_cast %c7_i32 : i32 to index
    %c0_68 = arith.constant 0 : index
    %c0_69 = arith.constant 0 : index
    %250 = vector.load %arg11[%249, %c0_68, %c0_69] : memref<8x8x128xf32, #tpu.memory_space<vmem>>, vector<1x8x128xf32>
    %251 = vector.shape_cast %250 : vector<1x8x128xf32> to vector<8x128xf32>
    %cst_70 = arith.constant dense<0.000000e+00> : vector<8x128xf32>
    %252 = tpu.matmul %244, %10, %cst_70 {dimension_numbers = #tpu.dot_dimension_numbers<[1], [0], [0], [1], [0, 0, 1, 1], [], []>} : vector<8x32xf32>, vector<32x128xf32>, vector<8x128xf32> -> vector<8x128xf32>
    %253 = arith.addf %251, %252 : vector<8x128xf32>
    %254 = vector.extract_strided_slice %253 {offsets = [0, 0], sizes = [8, 32], strides = [1, 1]} : vector<8x128xf32> to vector<8x32xf32>
    %255 = arith.negf %254 : vector<8x32xf32>
    %256 = math.exp %255 : vector<8x32xf32>
    %cst_71 = arith.constant 1.000000e+00 : f32
    %257 = vector.broadcast %cst_71 : f32 to vector<8x32xf32>
    %258 = arith.addf %257, %256 : vector<8x32xf32>
    %259 = arith.divf %257, %258 : vector<8x32xf32>
    %260 = vector.extract_strided_slice %253 {offsets = [0, 32], sizes = [8, 32], strides = [1, 1]} : vector<8x128xf32> to vector<8x32xf32>
    %261 = arith.negf %260 : vector<8x32xf32>
    %262 = math.exp %261 : vector<8x32xf32>
    %cst_72 = arith.constant 1.000000e+00 : f32
    %263 = vector.broadcast %cst_72 : f32 to vector<8x32xf32>
    %264 = arith.addf %263, %262 : vector<8x32xf32>
    %265 = arith.divf %263, %264 : vector<8x32xf32>
    %266 = vector.extract_strided_slice %253 {offsets = [0, 64], sizes = [8, 32], strides = [1, 1]} : vector<8x128xf32> to vector<8x32xf32>
    %267 = math.tanh %266 : vector<8x32xf32>
    %268 = vector.extract_strided_slice %253 {offsets = [0, 96], sizes = [8, 32], strides = [1, 1]} : vector<8x128xf32> to vector<8x32xf32>
    %269 = arith.negf %268 : vector<8x32xf32>
    %270 = math.exp %269 : vector<8x32xf32>
    %cst_73 = arith.constant 1.000000e+00 : f32
    %271 = vector.broadcast %cst_73 : f32 to vector<8x32xf32>
    %272 = arith.addf %271, %270 : vector<8x32xf32>
    %273 = arith.divf %271, %272 : vector<8x32xf32>
    %274 = arith.mulf %265, %242 : vector<8x32xf32>
    %275 = arith.mulf %259, %267 : vector<8x32xf32>
    %276 = arith.addf %274, %275 : vector<8x32xf32>
    %277 = math.tanh %276 : vector<8x32xf32>
    %278 = arith.mulf %273, %277 : vector<8x32xf32>
    %279 = arith.index_cast %c7_i32 : i32 to index
    %c0_74 = arith.constant 0 : index
    %c0_75 = arith.constant 0 : index
    %280 = vector.load %arg12[%279, %c0_74, %c0_75] : memref<8x8x32xf32, #tpu.memory_space<vmem>>, vector<1x8x32xf32>
    %281 = vector.shape_cast %280 : vector<1x8x32xf32> to vector<8x32xf32>
    %282 = vector.shape_cast %278 : vector<8x32xf32> to vector<1x8x32xf32>
    tpu.vector_store %arg12[%279, %c0_74, %c0_75], %282 {strides = array<i32>} : memref<8x8x32xf32, #tpu.memory_space<vmem>>, vector<1x8x32xf32>,
    %c8_i32 = arith.constant 8 : i32
    %c0_76 = arith.constant 0 : index
    %c0_77 = arith.constant 0 : index
    %c0_78 = arith.constant 0 : index
    %283 = vector.load %arg12[%c0_76, %c0_77, %c0_78] : memref<8x8x32xf32, #tpu.memory_space<vmem>>, vector<8x8x32xf32>
    %284 = vector.shape_cast %283 : vector<8x8x32xf32> to vector<64x32xf32>
    %c0_79 = arith.constant 0 : index
    %c0_80 = arith.constant 0 : index
    %285 = vector.load %arg5[%c0_79, %c0_80] : memref<32x128xf32, #tpu.memory_space<vmem>>, vector<32x128xf32>
    %cst_81 = arith.constant dense<0.000000e+00> : vector<64x128xf32>
    %286 = tpu.matmul %284, %285, %cst_81 {dimension_numbers = #tpu.dot_dimension_numbers<[1], [0], [0], [1], [0, 0, 1, 1], [], []>} : vector<64x32xf32>, vector<32x128xf32>, vector<64x128xf32> -> vector<64x128xf32>
    %c0_82 = arith.constant 0 : index
    %c0_83 = arith.constant 0 : index
    %287 = vector.load %arg7[%c0_82, %c0_83] : memref<1x128xf32, #tpu.memory_space<vmem>>, vector<1x128xf32>
    %288 = vector.broadcast %287 : vector<1x128xf32> to vector<64x128xf32>
    %289 = arith.addf %286, %288 : vector<64x128xf32>
    %290 = vector.shape_cast %289 : vector<64x128xf32> to vector<8x8x128xf32>
    %c0_84 = arith.constant 0 : index
    %c0_85 = arith.constant 0 : index
    %c0_86 = arith.constant 0 : index
    %291 = vector.load %arg11[%c0_84, %c0_85, %c0_86] : memref<8x8x128xf32, #tpu.memory_space<vmem>>, vector<8x8x128xf32>
    tpu.vector_store %arg11[%c0_84, %c0_85, %c0_86], %290 {strides = array<i32>} : memref<8x8x128xf32, #tpu.memory_space<vmem>>, vector<8x8x128xf32>,
    %c0_87 = arith.constant 0 : index
    %c0_88 = arith.constant 0 : index
    %292 = vector.load %arg6[%c0_87, %c0_88] : memref<32x128xf32, #tpu.memory_space<vmem>>, vector<32x128xf32>
    %c0_i32_89 = arith.constant 0 : i32
    %293 = arith.index_cast %c0_i32_89 : i32 to index
    %c0_90 = arith.constant 0 : index
    %c0_91 = arith.constant 0 : index
    %294 = vector.load %arg11[%293, %c0_90, %c0_91] : memref<8x8x128xf32, #tpu.memory_space<vmem>>, vector<1x8x128xf32>
    %295 = vector.shape_cast %294 : vector<1x8x128xf32> to vector<8x128xf32>
    %cst_92 = arith.constant dense<0.000000e+00> : vector<8x128xf32>
    %296 = tpu.matmul %0, %292, %cst_92 {dimension_numbers = #tpu.dot_dimension_numbers<[1], [0], [0], [1], [0, 0, 1, 1], [], []>} : vector<8x32xf32>, vector<32x128xf32>, vector<8x128xf32> -> vector<8x128xf32>
    %297 = arith.addf %295, %296 : vector<8x128xf32>
    %298 = vector.extract_strided_slice %297 {offsets = [0, 0], sizes = [8, 32], strides = [1, 1]} : vector<8x128xf32> to vector<8x32xf32>
    %299 = arith.negf %298 : vector<8x32xf32>
    %300 = math.exp %299 : vector<8x32xf32>
    %cst_93 = arith.constant 1.000000e+00 : f32
    %301 = vector.broadcast %cst_93 : f32 to vector<8x32xf32>
    %302 = arith.addf %301, %300 : vector<8x32xf32>
    %303 = arith.divf %301, %302 : vector<8x32xf32>
    %304 = vector.extract_strided_slice %297 {offsets = [0, 32], sizes = [8, 32], strides = [1, 1]} : vector<8x128xf32> to vector<8x32xf32>
    %305 = arith.negf %304 : vector<8x32xf32>
    %306 = math.exp %305 : vector<8x32xf32>
    %cst_94 = arith.constant 1.000000e+00 : f32
    %307 = vector.broadcast %cst_94 : f32 to vector<8x32xf32>
    %308 = arith.addf %307, %306 : vector<8x32xf32>
    %309 = arith.divf %307, %308 : vector<8x32xf32>
    %310 = vector.extract_strided_slice %297 {offsets = [0, 64], sizes = [8, 32], strides = [1, 1]} : vector<8x128xf32> to vector<8x32xf32>
    %311 = math.tanh %310 : vector<8x32xf32>
    %312 = vector.extract_strided_slice %297 {offsets = [0, 96], sizes = [8, 32], strides = [1, 1]} : vector<8x128xf32> to vector<8x32xf32>
    %313 = arith.negf %312 : vector<8x32xf32>
    %314 = math.exp %313 : vector<8x32xf32>
    %cst_95 = arith.constant 1.000000e+00 : f32
    %315 = vector.broadcast %cst_95 : f32 to vector<8x32xf32>
    %316 = arith.addf %315, %314 : vector<8x32xf32>
    %317 = arith.divf %315, %316 : vector<8x32xf32>
    %318 = arith.mulf %309, %0 : vector<8x32xf32>
    %319 = arith.mulf %303, %311 : vector<8x32xf32>
    %320 = arith.addf %318, %319 : vector<8x32xf32>
    %321 = math.tanh %320 : vector<8x32xf32>
    %322 = arith.mulf %317, %321 : vector<8x32xf32>
    %323 = arith.index_cast %c0_i32_89 : i32 to index
    %c0_96 = arith.constant 0 : index
    %c0_97 = arith.constant 0 : index
    %324 = vector.load %arg12[%323, %c0_96, %c0_97] : memref<8x8x32xf32, #tpu.memory_space<vmem>>, vector<1x8x32xf32>
    %325 = vector.shape_cast %324 : vector<1x8x32xf32> to vector<8x32xf32>
    %326 = vector.shape_cast %322 : vector<8x32xf32> to vector<1x8x32xf32>
    tpu.vector_store %arg12[%323, %c0_96, %c0_97], %326 {strides = array<i32>} : memref<8x8x32xf32, #tpu.memory_space<vmem>>, vector<1x8x32xf32>,
    %c1_i32_98 = arith.constant 1 : i32
    %327 = arith.index_cast %c1_i32_98 : i32 to index
    %c0_99 = arith.constant 0 : index
    %c0_100 = arith.constant 0 : index
    %328 = vector.load %arg11[%327, %c0_99, %c0_100] : memref<8x8x128xf32, #tpu.memory_space<vmem>>, vector<1x8x128xf32>
    %329 = vector.shape_cast %328 : vector<1x8x128xf32> to vector<8x128xf32>
    %cst_101 = arith.constant dense<0.000000e+00> : vector<8x128xf32>
    %330 = tpu.matmul %322, %292, %cst_101 {dimension_numbers = #tpu.dot_dimension_numbers<[1], [0], [0], [1], [0, 0, 1, 1], [], []>} : vector<8x32xf32>, vector<32x128xf32>, vector<8x128xf32> -> vector<8x128xf32>
    %331 = arith.addf %329, %330 : vector<8x128xf32>
    %332 = vector.extract_strided_slice %331 {offsets = [0, 0], sizes = [8, 32], strides = [1, 1]} : vector<8x128xf32> to vector<8x32xf32>
    %333 = arith.negf %332 : vector<8x32xf32>
    %334 = math.exp %333 : vector<8x32xf32>
    %cst_102 = arith.constant 1.000000e+00 : f32
    %335 = vector.broadcast %cst_102 : f32 to vector<8x32xf32>
    %336 = arith.addf %335, %334 : vector<8x32xf32>
    %337 = arith.divf %335, %336 : vector<8x32xf32>
    %338 = vector.extract_strided_slice %331 {offsets = [0, 32], sizes = [8, 32], strides = [1, 1]} : vector<8x128xf32> to vector<8x32xf32>
    %339 = arith.negf %338 : vector<8x32xf32>
    %340 = math.exp %339 : vector<8x32xf32>
    %cst_103 = arith.constant 1.000000e+00 : f32
    %341 = vector.broadcast %cst_103 : f32 to vector<8x32xf32>
    %342 = arith.addf %341, %340 : vector<8x32xf32>
    %343 = arith.divf %341, %342 : vector<8x32xf32>
    %344 = vector.extract_strided_slice %331 {offsets = [0, 64], sizes = [8, 32], strides = [1, 1]} : vector<8x128xf32> to vector<8x32xf32>
    %345 = math.tanh %344 : vector<8x32xf32>
    %346 = vector.extract_strided_slice %331 {offsets = [0, 96], sizes = [8, 32], strides = [1, 1]} : vector<8x128xf32> to vector<8x32xf32>
    %347 = arith.negf %346 : vector<8x32xf32>
    %348 = math.exp %347 : vector<8x32xf32>
    %cst_104 = arith.constant 1.000000e+00 : f32
    %349 = vector.broadcast %cst_104 : f32 to vector<8x32xf32>
    %350 = arith.addf %349, %348 : vector<8x32xf32>
    %351 = arith.divf %349, %350 : vector<8x32xf32>
    %352 = arith.mulf %343, %320 : vector<8x32xf32>
    %353 = arith.mulf %337, %345 : vector<8x32xf32>
    %354 = arith.addf %352, %353 : vector<8x32xf32>
    %355 = math.tanh %354 : vector<8x32xf32>
    %356 = arith.mulf %351, %355 : vector<8x32xf32>
    %357 = arith.index_cast %c1_i32_98 : i32 to index
    %c0_105 = arith.constant 0 : index
    %c0_106 = arith.constant 0 : index
    %358 = vector.load %arg12[%357, %c0_105, %c0_106] : memref<8x8x32xf32, #tpu.memory_space<vmem>>, vector<1x8x32xf32>
    %359 = vector.shape_cast %358 : vector<1x8x32xf32> to vector<8x32xf32>
    %360 = vector.shape_cast %356 : vector<8x32xf32> to vector<1x8x32xf32>
    tpu.vector_store %arg12[%357, %c0_105, %c0_106], %360 {strides = array<i32>} : memref<8x8x32xf32, #tpu.memory_space<vmem>>, vector<1x8x32xf32>,
    %c2_i32_107 = arith.constant 2 : i32
    %361 = arith.index_cast %c2_i32_107 : i32 to index
    %c0_108 = arith.constant 0 : index
    %c0_109 = arith.constant 0 : index
    %362 = vector.load %arg11[%361, %c0_108, %c0_109] : memref<8x8x128xf32, #tpu.memory_space<vmem>>, vector<1x8x128xf32>
    %363 = vector.shape_cast %362 : vector<1x8x128xf32> to vector<8x128xf32>
    %cst_110 = arith.constant dense<0.000000e+00> : vector<8x128xf32>
    %364 = tpu.matmul %356, %292, %cst_110 {dimension_numbers = #tpu.dot_dimension_numbers<[1], [0], [0], [1], [0, 0, 1, 1], [], []>} : vector<8x32xf32>, vector<32x128xf32>, vector<8x128xf32> -> vector<8x128xf32>
    %365 = arith.addf %363, %364 : vector<8x128xf32>
    %366 = vector.extract_strided_slice %365 {offsets = [0, 0], sizes = [8, 32], strides = [1, 1]} : vector<8x128xf32> to vector<8x32xf32>
    %367 = arith.negf %366 : vector<8x32xf32>
    %368 = math.exp %367 : vector<8x32xf32>
    %cst_111 = arith.constant 1.000000e+00 : f32
    %369 = vector.broadcast %cst_111 : f32 to vector<8x32xf32>
    %370 = arith.addf %369, %368 : vector<8x32xf32>
    %371 = arith.divf %369, %370 : vector<8x32xf32>
    %372 = vector.extract_strided_slice %365 {offsets = [0, 32], sizes = [8, 32], strides = [1, 1]} : vector<8x128xf32> to vector<8x32xf32>
    %373 = arith.negf %372 : vector<8x32xf32>
    %374 = math.exp %373 : vector<8x32xf32>
    %cst_112 = arith.constant 1.000000e+00 : f32
    %375 = vector.broadcast %cst_112 : f32 to vector<8x32xf32>
    %376 = arith.addf %375, %374 : vector<8x32xf32>
    %377 = arith.divf %375, %376 : vector<8x32xf32>
    %378 = vector.extract_strided_slice %365 {offsets = [0, 64], sizes = [8, 32], strides = [1, 1]} : vector<8x128xf32> to vector<8x32xf32>
    %379 = math.tanh %378 : vector<8x32xf32>
    %380 = vector.extract_strided_slice %365 {offsets = [0, 96], sizes = [8, 32], strides = [1, 1]} : vector<8x128xf32> to vector<8x32xf32>
    %381 = arith.negf %380 : vector<8x32xf32>
    %382 = math.exp %381 : vector<8x32xf32>
    %cst_113 = arith.constant 1.000000e+00 : f32
    %383 = vector.broadcast %cst_113 : f32 to vector<8x32xf32>
    %384 = arith.addf %383, %382 : vector<8x32xf32>
    %385 = arith.divf %383, %384 : vector<8x32xf32>
    %386 = arith.mulf %377, %354 : vector<8x32xf32>
    %387 = arith.mulf %371, %379 : vector<8x32xf32>
    %388 = arith.addf %386, %387 : vector<8x32xf32>
    %389 = math.tanh %388 : vector<8x32xf32>
    %390 = arith.mulf %385, %389 : vector<8x32xf32>
    %391 = arith.index_cast %c2_i32_107 : i32 to index
    %c0_114 = arith.constant 0 : index
    %c0_115 = arith.constant 0 : index
    %392 = vector.load %arg12[%391, %c0_114, %c0_115] : memref<8x8x32xf32, #tpu.memory_space<vmem>>, vector<1x8x32xf32>
    %393 = vector.shape_cast %392 : vector<1x8x32xf32> to vector<8x32xf32>
    %394 = vector.shape_cast %390 : vector<8x32xf32> to vector<1x8x32xf32>
    tpu.vector_store %arg12[%391, %c0_114, %c0_115], %394 {strides = array<i32>} : memref<8x8x32xf32, #tpu.memory_space<vmem>>, vector<1x8x32xf32>,
    %c3_i32_116 = arith.constant 3 : i32
    %395 = arith.index_cast %c3_i32_116 : i32 to index
    %c0_117 = arith.constant 0 : index
    %c0_118 = arith.constant 0 : index
    %396 = vector.load %arg11[%395, %c0_117, %c0_118] : memref<8x8x128xf32, #tpu.memory_space<vmem>>, vector<1x8x128xf32>
    %397 = vector.shape_cast %396 : vector<1x8x128xf32> to vector<8x128xf32>
    %cst_119 = arith.constant dense<0.000000e+00> : vector<8x128xf32>
    %398 = tpu.matmul %390, %292, %cst_119 {dimension_numbers = #tpu.dot_dimension_numbers<[1], [0], [0], [1], [0, 0, 1, 1], [], []>} : vector<8x32xf32>, vector<32x128xf32>, vector<8x128xf32> -> vector<8x128xf32>
    %399 = arith.addf %397, %398 : vector<8x128xf32>
    %400 = vector.extract_strided_slice %399 {offsets = [0, 0], sizes = [8, 32], strides = [1, 1]} : vector<8x128xf32> to vector<8x32xf32>
    %401 = arith.negf %400 : vector<8x32xf32>
    %402 = math.exp %401 : vector<8x32xf32>
    %cst_120 = arith.constant 1.000000e+00 : f32
    %403 = vector.broadcast %cst_120 : f32 to vector<8x32xf32>
    %404 = arith.addf %403, %402 : vector<8x32xf32>
    %405 = arith.divf %403, %404 : vector<8x32xf32>
    %406 = vector.extract_strided_slice %399 {offsets = [0, 32], sizes = [8, 32], strides = [1, 1]} : vector<8x128xf32> to vector<8x32xf32>
    %407 = arith.negf %406 : vector<8x32xf32>
    %408 = math.exp %407 : vector<8x32xf32>
    %cst_121 = arith.constant 1.000000e+00 : f32
    %409 = vector.broadcast %cst_121 : f32 to vector<8x32xf32>
    %410 = arith.addf %409, %408 : vector<8x32xf32>
    %411 = arith.divf %409, %410 : vector<8x32xf32>
    %412 = vector.extract_strided_slice %399 {offsets = [0, 64], sizes = [8, 32], strides = [1, 1]} : vector<8x128xf32> to vector<8x32xf32>
    %413 = math.tanh %412 : vector<8x32xf32>
    %414 = vector.extract_strided_slice %399 {offsets = [0, 96], sizes = [8, 32], strides = [1, 1]} : vector<8x128xf32> to vector<8x32xf32>
    %415 = arith.negf %414 : vector<8x32xf32>
    %416 = math.exp %415 : vector<8x32xf32>
    %cst_122 = arith.constant 1.000000e+00 : f32
    %417 = vector.broadcast %cst_122 : f32 to vector<8x32xf32>
    %418 = arith.addf %417, %416 : vector<8x32xf32>
    %419 = arith.divf %417, %418 : vector<8x32xf32>
    %420 = arith.mulf %411, %388 : vector<8x32xf32>
    %421 = arith.mulf %405, %413 : vector<8x32xf32>
    %422 = arith.addf %420, %421 : vector<8x32xf32>
    %423 = math.tanh %422 : vector<8x32xf32>
    %424 = arith.mulf %419, %423 : vector<8x32xf32>
    %425 = arith.index_cast %c3_i32_116 : i32 to index
    %c0_123 = arith.constant 0 : index
    %c0_124 = arith.constant 0 : index
    %426 = vector.load %arg12[%425, %c0_123, %c0_124] : memref<8x8x32xf32, #tpu.memory_space<vmem>>, vector<1x8x32xf32>
    %427 = vector.shape_cast %426 : vector<1x8x32xf32> to vector<8x32xf32>
    %428 = vector.shape_cast %424 : vector<8x32xf32> to vector<1x8x32xf32>
    tpu.vector_store %arg12[%425, %c0_123, %c0_124], %428 {strides = array<i32>} : memref<8x8x32xf32, #tpu.memory_space<vmem>>, vector<1x8x32xf32>,
    %c4_i32_125 = arith.constant 4 : i32
    %429 = arith.index_cast %c4_i32_125 : i32 to index
    %c0_126 = arith.constant 0 : index
    %c0_127 = arith.constant 0 : index
    %430 = vector.load %arg11[%429, %c0_126, %c0_127] : memref<8x8x128xf32, #tpu.memory_space<vmem>>, vector<1x8x128xf32>
    %431 = vector.shape_cast %430 : vector<1x8x128xf32> to vector<8x128xf32>
    %cst_128 = arith.constant dense<0.000000e+00> : vector<8x128xf32>
    %432 = tpu.matmul %424, %292, %cst_128 {dimension_numbers = #tpu.dot_dimension_numbers<[1], [0], [0], [1], [0, 0, 1, 1], [], []>} : vector<8x32xf32>, vector<32x128xf32>, vector<8x128xf32> -> vector<8x128xf32>
    %433 = arith.addf %431, %432 : vector<8x128xf32>
    %434 = vector.extract_strided_slice %433 {offsets = [0, 0], sizes = [8, 32], strides = [1, 1]} : vector<8x128xf32> to vector<8x32xf32>
    %435 = arith.negf %434 : vector<8x32xf32>
    %436 = math.exp %435 : vector<8x32xf32>
    %cst_129 = arith.constant 1.000000e+00 : f32
    %437 = vector.broadcast %cst_129 : f32 to vector<8x32xf32>
    %438 = arith.addf %437, %436 : vector<8x32xf32>
    %439 = arith.divf %437, %438 : vector<8x32xf32>
    %440 = vector.extract_strided_slice %433 {offsets = [0, 32], sizes = [8, 32], strides = [1, 1]} : vector<8x128xf32> to vector<8x32xf32>
    %441 = arith.negf %440 : vector<8x32xf32>
    %442 = math.exp %441 : vector<8x32xf32>
    %cst_130 = arith.constant 1.000000e+00 : f32
    %443 = vector.broadcast %cst_130 : f32 to vector<8x32xf32>
    %444 = arith.addf %443, %442 : vector<8x32xf32>
    %445 = arith.divf %443, %444 : vector<8x32xf32>
    %446 = vector.extract_strided_slice %433 {offsets = [0, 64], sizes = [8, 32], strides = [1, 1]} : vector<8x128xf32> to vector<8x32xf32>
    %447 = math.tanh %446 : vector<8x32xf32>
    %448 = vector.extract_strided_slice %433 {offsets = [0, 96], sizes = [8, 32], strides = [1, 1]} : vector<8x128xf32> to vector<8x32xf32>
    %449 = arith.negf %448 : vector<8x32xf32>
    %450 = math.exp %449 : vector<8x32xf32>
    %cst_131 = arith.constant 1.000000e+00 : f32
    %451 = vector.broadcast %cst_131 : f32 to vector<8x32xf32>
    %452 = arith.addf %451, %450 : vector<8x32xf32>
    %453 = arith.divf %451, %452 : vector<8x32xf32>
    %454 = arith.mulf %445, %422 : vector<8x32xf32>
    %455 = arith.mulf %439, %447 : vector<8x32xf32>
    %456 = arith.addf %454, %455 : vector<8x32xf32>
    %457 = math.tanh %456 : vector<8x32xf32>
    %458 = arith.mulf %453, %457 : vector<8x32xf32>
    %459 = arith.index_cast %c4_i32_125 : i32 to index
    %c0_132 = arith.constant 0 : index
    %c0_133 = arith.constant 0 : index
    %460 = vector.load %arg12[%459, %c0_132, %c0_133] : memref<8x8x32xf32, #tpu.memory_space<vmem>>, vector<1x8x32xf32>
    %461 = vector.shape_cast %460 : vector<1x8x32xf32> to vector<8x32xf32>
    %462 = vector.shape_cast %458 : vector<8x32xf32> to vector<1x8x32xf32>
    tpu.vector_store %arg12[%459, %c0_132, %c0_133], %462 {strides = array<i32>} : memref<8x8x32xf32, #tpu.memory_space<vmem>>, vector<1x8x32xf32>,
    %c5_i32_134 = arith.constant 5 : i32
    %463 = arith.index_cast %c5_i32_134 : i32 to index
    %c0_135 = arith.constant 0 : index
    %c0_136 = arith.constant 0 : index
    %464 = vector.load %arg11[%463, %c0_135, %c0_136] : memref<8x8x128xf32, #tpu.memory_space<vmem>>, vector<1x8x128xf32>
    %465 = vector.shape_cast %464 : vector<1x8x128xf32> to vector<8x128xf32>
    %cst_137 = arith.constant dense<0.000000e+00> : vector<8x128xf32>
    %466 = tpu.matmul %458, %292, %cst_137 {dimension_numbers = #tpu.dot_dimension_numbers<[1], [0], [0], [1], [0, 0, 1, 1], [], []>} : vector<8x32xf32>, vector<32x128xf32>, vector<8x128xf32> -> vector<8x128xf32>
    %467 = arith.addf %465, %466 : vector<8x128xf32>
    %468 = vector.extract_strided_slice %467 {offsets = [0, 0], sizes = [8, 32], strides = [1, 1]} : vector<8x128xf32> to vector<8x32xf32>
    %469 = arith.negf %468 : vector<8x32xf32>
    %470 = math.exp %469 : vector<8x32xf32>
    %cst_138 = arith.constant 1.000000e+00 : f32
    %471 = vector.broadcast %cst_138 : f32 to vector<8x32xf32>
    %472 = arith.addf %471, %470 : vector<8x32xf32>
    %473 = arith.divf %471, %472 : vector<8x32xf32>
    %474 = vector.extract_strided_slice %467 {offsets = [0, 32], sizes = [8, 32], strides = [1, 1]} : vector<8x128xf32> to vector<8x32xf32>
    %475 = arith.negf %474 : vector<8x32xf32>
    %476 = math.exp %475 : vector<8x32xf32>
    %cst_139 = arith.constant 1.000000e+00 : f32
    %477 = vector.broadcast %cst_139 : f32 to vector<8x32xf32>
    %478 = arith.addf %477, %476 : vector<8x32xf32>
    %479 = arith.divf %477, %478 : vector<8x32xf32>
    %480 = vector.extract_strided_slice %467 {offsets = [0, 64], sizes = [8, 32], strides = [1, 1]} : vector<8x128xf32> to vector<8x32xf32>
    %481 = math.tanh %480 : vector<8x32xf32>
    %482 = vector.extract_strided_slice %467 {offsets = [0, 96], sizes = [8, 32], strides = [1, 1]} : vector<8x128xf32> to vector<8x32xf32>
    %483 = arith.negf %482 : vector<8x32xf32>
    %484 = math.exp %483 : vector<8x32xf32>
    %cst_140 = arith.constant 1.000000e+00 : f32
    %485 = vector.broadcast %cst_140 : f32 to vector<8x32xf32>
    %486 = arith.addf %485, %484 : vector<8x32xf32>
    %487 = arith.divf %485, %486 : vector<8x32xf32>
    %488 = arith.mulf %479, %456 : vector<8x32xf32>
    %489 = arith.mulf %473, %481 : vector<8x32xf32>
    %490 = arith.addf %488, %489 : vector<8x32xf32>
    %491 = math.tanh %490 : vector<8x32xf32>
    %492 = arith.mulf %487, %491 : vector<8x32xf32>
    %493 = arith.index_cast %c5_i32_134 : i32 to index
    %c0_141 = arith.constant 0 : index
    %c0_142 = arith.constant 0 : index
    %494 = vector.load %arg12[%493, %c0_141, %c0_142] : memref<8x8x32xf32, #tpu.memory_space<vmem>>, vector<1x8x32xf32>
    %495 = vector.shape_cast %494 : vector<1x8x32xf32> to vector<8x32xf32>
    %496 = vector.shape_cast %492 : vector<8x32xf32> to vector<1x8x32xf32>
    tpu.vector_store %arg12[%493, %c0_141, %c0_142], %496 {strides = array<i32>} : memref<8x8x32xf32, #tpu.memory_space<vmem>>, vector<1x8x32xf32>,
    %c6_i32_143 = arith.constant 6 : i32
    %497 = arith.index_cast %c6_i32_143 : i32 to index
    %c0_144 = arith.constant 0 : index
    %c0_145 = arith.constant 0 : index
    %498 = vector.load %arg11[%497, %c0_144, %c0_145] : memref<8x8x128xf32, #tpu.memory_space<vmem>>, vector<1x8x128xf32>
    %499 = vector.shape_cast %498 : vector<1x8x128xf32> to vector<8x128xf32>
    %cst_146 = arith.constant dense<0.000000e+00> : vector<8x128xf32>
    %500 = tpu.matmul %492, %292, %cst_146 {dimension_numbers = #tpu.dot_dimension_numbers<[1], [0], [0], [1], [0, 0, 1, 1], [], []>} : vector<8x32xf32>, vector<32x128xf32>, vector<8x128xf32> -> vector<8x128xf32>
    %501 = arith.addf %499, %500 : vector<8x128xf32>
    %502 = vector.extract_strided_slice %501 {offsets = [0, 0], sizes = [8, 32], strides = [1, 1]} : vector<8x128xf32> to vector<8x32xf32>
    %503 = arith.negf %502 : vector<8x32xf32>
    %504 = math.exp %503 : vector<8x32xf32>
    %cst_147 = arith.constant 1.000000e+00 : f32
    %505 = vector.broadcast %cst_147 : f32 to vector<8x32xf32>
    %506 = arith.addf %505, %504 : vector<8x32xf32>
    %507 = arith.divf %505, %506 : vector<8x32xf32>
    %508 = vector.extract_strided_slice %501 {offsets = [0, 32], sizes = [8, 32], strides = [1, 1]} : vector<8x128xf32> to vector<8x32xf32>
    %509 = arith.negf %508 : vector<8x32xf32>
    %510 = math.exp %509 : vector<8x32xf32>
    %cst_148 = arith.constant 1.000000e+00 : f32
    %511 = vector.broadcast %cst_148 : f32 to vector<8x32xf32>
    %512 = arith.addf %511, %510 : vector<8x32xf32>
    %513 = arith.divf %511, %512 : vector<8x32xf32>
    %514 = vector.extract_strided_slice %501 {offsets = [0, 64], sizes = [8, 32], strides = [1, 1]} : vector<8x128xf32> to vector<8x32xf32>
    %515 = math.tanh %514 : vector<8x32xf32>
    %516 = vector.extract_strided_slice %501 {offsets = [0, 96], sizes = [8, 32], strides = [1, 1]} : vector<8x128xf32> to vector<8x32xf32>
    %517 = arith.negf %516 : vector<8x32xf32>
    %518 = math.exp %517 : vector<8x32xf32>
    %cst_149 = arith.constant 1.000000e+00 : f32
    %519 = vector.broadcast %cst_149 : f32 to vector<8x32xf32>
    %520 = arith.addf %519, %518 : vector<8x32xf32>
    %521 = arith.divf %519, %520 : vector<8x32xf32>
    %522 = arith.mulf %513, %490 : vector<8x32xf32>
    %523 = arith.mulf %507, %515 : vector<8x32xf32>
    %524 = arith.addf %522, %523 : vector<8x32xf32>
    %525 = math.tanh %524 : vector<8x32xf32>
    %526 = arith.mulf %521, %525 : vector<8x32xf32>
    %527 = arith.index_cast %c6_i32_143 : i32 to index
    %c0_150 = arith.constant 0 : index
    %c0_151 = arith.constant 0 : index
    %528 = vector.load %arg12[%527, %c0_150, %c0_151] : memref<8x8x32xf32, #tpu.memory_space<vmem>>, vector<1x8x32xf32>
    %529 = vector.shape_cast %528 : vector<1x8x32xf32> to vector<8x32xf32>
    %530 = vector.shape_cast %526 : vector<8x32xf32> to vector<1x8x32xf32>
    tpu.vector_store %arg12[%527, %c0_150, %c0_151], %530 {strides = array<i32>} : memref<8x8x32xf32, #tpu.memory_space<vmem>>, vector<1x8x32xf32>,
    %c7_i32_152 = arith.constant 7 : i32
    %531 = arith.index_cast %c7_i32_152 : i32 to index
    %c0_153 = arith.constant 0 : index
    %c0_154 = arith.constant 0 : index
    %532 = vector.load %arg11[%531, %c0_153, %c0_154] : memref<8x8x128xf32, #tpu.memory_space<vmem>>, vector<1x8x128xf32>
    %533 = vector.shape_cast %532 : vector<1x8x128xf32> to vector<8x128xf32>
    %cst_155 = arith.constant dense<0.000000e+00> : vector<8x128xf32>
    %534 = tpu.matmul %526, %292, %cst_155 {dimension_numbers = #tpu.dot_dimension_numbers<[1], [0], [0], [1], [0, 0, 1, 1], [], []>} : vector<8x32xf32>, vector<32x128xf32>, vector<8x128xf32> -> vector<8x128xf32>
    %535 = arith.addf %533, %534 : vector<8x128xf32>
    %536 = vector.extract_strided_slice %535 {offsets = [0, 0], sizes = [8, 32], strides = [1, 1]} : vector<8x128xf32> to vector<8x32xf32>
    %537 = arith.negf %536 : vector<8x32xf32>
    %538 = math.exp %537 : vector<8x32xf32>
    %cst_156 = arith.constant 1.000000e+00 : f32
    %539 = vector.broadcast %cst_156 : f32 to vector<8x32xf32>
    %540 = arith.addf %539, %538 : vector<8x32xf32>
    %541 = arith.divf %539, %540 : vector<8x32xf32>
    %542 = vector.extract_strided_slice %535 {offsets = [0, 32], sizes = [8, 32], strides = [1, 1]} : vector<8x128xf32> to vector<8x32xf32>
    %543 = arith.negf %542 : vector<8x32xf32>
    %544 = math.exp %543 : vector<8x32xf32>
    %cst_157 = arith.constant 1.000000e+00 : f32
    %545 = vector.broadcast %cst_157 : f32 to vector<8x32xf32>
    %546 = arith.addf %545, %544 : vector<8x32xf32>
    %547 = arith.divf %545, %546 : vector<8x32xf32>
    %548 = vector.extract_strided_slice %535 {offsets = [0, 64], sizes = [8, 32], strides = [1, 1]} : vector<8x128xf32> to vector<8x32xf32>
    %549 = math.tanh %548 : vector<8x32xf32>
    %550 = vector.extract_strided_slice %535 {offsets = [0, 96], sizes = [8, 32], strides = [1, 1]} : vector<8x128xf32> to vector<8x32xf32>
    %551 = arith.negf %550 : vector<8x32xf32>
    %552 = math.exp %551 : vector<8x32xf32>
    %cst_158 = arith.constant 1.000000e+00 : f32
    %553 = vector.broadcast %cst_158 : f32 to vector<8x32xf32>
    %554 = arith.addf %553, %552 : vector<8x32xf32>
    %555 = arith.divf %553, %554 : vector<8x32xf32>
    %556 = arith.mulf %547, %524 : vector<8x32xf32>
    %557 = arith.mulf %541, %549 : vector<8x32xf32>
    %558 = arith.addf %556, %557 : vector<8x32xf32>
    %559 = math.tanh %558 : vector<8x32xf32>
    %560 = arith.mulf %555, %559 : vector<8x32xf32>
    %561 = arith.index_cast %c7_i32_152 : i32 to index
    %c0_159 = arith.constant 0 : index
    %c0_160 = arith.constant 0 : index
    %562 = vector.load %arg12[%561, %c0_159, %c0_160] : memref<8x8x32xf32, #tpu.memory_space<vmem>>, vector<1x8x32xf32>
    %563 = vector.shape_cast %562 : vector<1x8x32xf32> to vector<8x32xf32>
    %564 = vector.shape_cast %560 : vector<8x32xf32> to vector<1x8x32xf32>
    tpu.vector_store %arg12[%561, %c0_159, %c0_160], %564 {strides = array<i32>} : memref<8x8x32xf32, #tpu.memory_space<vmem>>, vector<1x8x32xf32>,
    %c8_i32_161 = arith.constant 8 : i32
    %c0_162 = arith.constant 0 : index
    %c0_163 = arith.constant 0 : index
    %c0_164 = arith.constant 0 : index
    %565 = vector.load %arg12[%c0_162, %c0_163, %c0_164] : memref<8x8x32xf32, #tpu.memory_space<vmem>>, vector<8x8x32xf32>
    %566 = vector.shape_cast %565 : vector<8x8x32xf32> to vector<64x32xf32>
    %c0_165 = arith.constant 0 : index
    %c0_166 = arith.constant 0 : index
    %567 = vector.load %arg8[%c0_165, %c0_166] : memref<32x4xf32, #tpu.memory_space<vmem>>, vector<32x4xf32>
    %cst_167 = arith.constant dense<0.000000e+00> : vector<64x4xf32>
    %568 = tpu.matmul %566, %567, %cst_167 {dimension_numbers = #tpu.dot_dimension_numbers<[1], [0], [0], [1], [0, 0, 1, 1], [], []>} : vector<64x32xf32>, vector<32x4xf32>, vector<64x4xf32> -> vector<64x4xf32>
    %c0_168 = arith.constant 0 : index
    %c0_169 = arith.constant 0 : index
    %569 = vector.load %arg9[%c0_168, %c0_169] : memref<1x4xf32, #tpu.memory_space<vmem>>, vector<1x4xf32>
    %570 = vector.broadcast %569 : vector<1x4xf32> to vector<64x4xf32>
    %571 = arith.addf %568, %570 : vector<64x4xf32>
    %572 = vector.shape_cast %571 : vector<64x4xf32> to vector<8x8x4xf32>
    %c0_170 = arith.constant 0 : index
    %c0_171 = arith.constant 0 : index
    %c0_172 = arith.constant 0 : index
    %573 = vector.load %arg10[%c0_170, %c0_171, %c0_172] : memref<8x8x4xf32, #tpu.memory_space<vmem>>, vector<8x8x4xf32>
    tpu.vector_store %arg10[%c0_170, %c0_171, %c0_172], %572 {strides = array<i32>} : memref<8x8x4xf32, #tpu.memory_space<vmem>>, vector<8x8x4xf32>,
    return
  }
  func.func @transform_0(%arg0: i32) -> (i32, i32, i32) {
    %c0_i32 = arith.constant 0 : i32
    %c0_i32_0 = arith.constant 0 : i32
    %c0_i32_1 = arith.constant 0 : i32
    %c0_i32_2 = arith.constant 0 : i32
    return %c0_i32, %c0_i32_0, %c0_i32_1 : i32, i32, i32
  }
  func.func @transform_1(%arg0: i32) -> (i32, i32) {
    %c0_i32 = arith.constant 0 : i32
    %c0_i32_0 = arith.constant 0 : i32
    %c0_i32_1 = arith.constant 0 : i32
    return %c0_i32, %c0_i32_0 : i32, i32
  }
  func.func @transform_2(%arg0: i32) -> (i32, i32) {
    %c0_i32 = arith.constant 0 : i32
    %c0_i32_0 = arith.constant 0 : i32
    %c0_i32_1 = arith.constant 0 : i32
    return %c0_i32, %c0_i32_0 : i32, i32
  }
  func.func @transform_3(%arg0: i32) -> (i32, i32) {
    %c0_i32 = arith.constant 0 : i32
    %c0_i32_0 = arith.constant 0 : i32
    %c0_i32_1 = arith.constant 0 : i32
    return %c0_i32, %c0_i32_0 : i32, i32
  }
  func.func @transform_4(%arg0: i32) -> (i32, i32) {
    %c0_i32 = arith.constant 0 : i32
    %c0_i32_0 = arith.constant 0 : i32
    %c0_i32_1 = arith.constant 0 : i32
    return %c0_i32, %c0_i32_0 : i32, i32
  }
  func.func @transform_5(%arg0: i32) -> (i32, i32) {
    %c0_i32 = arith.constant 0 : i32
    %c0_i32_0 = arith.constant 0 : i32
    %c0_i32_1 = arith.constant 0 : i32
    return %c0_i32, %c0_i32_0 : i32, i32
  }
  func.func @transform_6(%arg0: i32) -> (i32, i32) {
    %c0_i32 = arith.constant 0 : i32
    %c0_i32_0 = arith.constant 0 : i32
    %c0_i32_1 = arith.constant 0 : i32
    return %c0_i32, %c0_i32_0 : i32, i32
  }
  func.func @transform_7(%arg0: i32) -> (i32, i32) {
    %c0_i32 = arith.constant 0 : i32
    %c0_i32_0 = arith.constant 0 : i32
    %c0_i32_1 = arith.constant 0 : i32
    return %c0_i32, %c0_i32_0 : i32, i32
  }
  func.func @transform_8(%arg0: i32) -> (i32, i32) {
    %c0_i32 = arith.constant 0 : i32
    %c0_i32_0 = arith.constant 0 : i32
    %c0_i32_1 = arith.constant 0 : i32
    return %c0_i32, %c0_i32_0 : i32, i32
  }
  func.func @transform_9(%arg0: i32) -> (i32, i32, i32) {
    %c0_i32 = arith.constant 0 : i32
    %c0_i32_0 = arith.constant 0 : i32
    %c0_i32_1 = arith.constant 0 : i32
    %c0_i32_2 = arith.constant 0 : i32
    return %c0_i32, %c0_i32_0, %c0_i32_1 : i32, i32, i32
  }
}

</mosaic_0001>

<bundles_post_ra>
// kernel: lstm_forward.1
= control target key start
LH: loop header
LB: loop body
LE: loop exit
PB: predicated region body
PF: predicated region fallthrough
CT: control target
= control target key end

     0   :  { %vm49_vm0 = vcmask 130048   ;;  %v2713_v6 = vmov 0.0   ;;  %vm2714_vm1 = vmmov 0   ;;  %s2715_s12 = smov 64   ;;  %vm192_vm2 = vcmask 261120   ;;  %s3247_s1 = inlined_call_operand.vmem [shape: f32[16,128], index: 1, kind: input, shape index: {}]   ;;  %s3248_s0 = inlined_call_operand.vmem [shape: f32[8,8,16], index: 0, kind: input, shape index: {}]   ;;  %s3249_s2 = inlined_call_operand.vmem [shape: f32[32,128], index: 2, kind: input, shape index: {}]   ;;  %s3250_s3 = inlined_call_operand.vmem [shape: f32[1,128], index: 3, kind: input, shape index: {}]   ;;  %s3251_s4 = inlined_call_operand.vmem [shape: f32[32,128], index: 4, kind: input, shape index: {}]   ;;  %s3252_s5 = inlined_call_operand.vmem [shape: f32[32,128], index: 5, kind: input, shape index: {}]   ;;  %s3253_s6 = inlined_call_operand.vmem [shape: f32[1,128], index: 6, kind: input, shape index: {}]   ;;  %s3254_s7 = inlined_call_operand.vmem [shape: f32[32,4], index: 7, kind: input, shape index: {}]   ;;  %s3255_s8 = inlined_call_operand.vmem [shape: f32[1,4], index: 8, kind: input, shape index: {}]   ;;  %s3256_s9 = inlined_call_operand.vmem [shape: f32[8,8,4], index: 9, kind: output, shape index: {}]  }
   0x1   :  { %v41_v0 = vld [vmem:[%s3247_s1 + $0x8] sm:$0xff]  ;;  %v40_v1 = vld [vmem:[%s3247_s1] sm:$0xff]  ;;  %v2783_v4 = vld [vmem:[%s3249_s2 + $0x18] sm:$0xff]  ;;  %vm2161_vm3 = vcmask 31744  }
   0x2   :  { %v36_v2 = vld [vmem:[%s3248_s0 + $0x20] sm:$0xff]  ;;  %2577 = vmatprep.subr.mxu1 %v41_v0  ;;  %2345 = vmatprep.subr.mxu0 %v41_v0  ;;  %v37_v3 = vld [vmem:[%s3248_s0 + $0x28] sm:$0xff]  ;;  %v38_v8 = vld [vmem:[%s3248_s0 + $0x30] sm:$0xff] }
   0x3   :  { %2579 = vmatpush3.msra.mxu1 %v41_v0  ;;  %2355 = vmatprep.mubr.msk.f32.mxu1 %vm49_vm0, %v36_v2  ;;  %v32_v5 = vld [vmem:[%s3248_s0] sm:$0xff]  ;;  %v33_v7 = vld [vmem:[%s3248_s0 + $0x8] sm:$0xff]  ;;  %v2800_v9 = vld [vmem:[%s3249_s2 + $0x10] sm:$0xff] }
   0x4   :  { %2578 = vmatprep.subr.mxu1 %v40_v1  ;;  %2346 = vmatpush3.msra.mxu0 %v41_v0  ;;  %v39_v10 = vld [vmem:[%s3248_s0 + $0x38] sm:$0xff]  ;;  %v2812_v11 = vld [vmem:[%s3249_s2 + $0x8] sm:$0xff]  ;;  %v2821_v12 = vld [vmem:[%s3249_s2] sm:$0xff] }
   0x5   :  { %2580 = vmatpush3.msra.mxu1 %v40_v1  ;;  %2347 = vmatprep.subr.mxu0 %v40_v1  ;;  %v2857_v18 = vld [vmem:[%s3250_s3] ss:$0 sm:$0xff]  ;;  %s2716_s3 = smov 32   ;;  %v34_v52 = vld [vmem:[%s3248_s0 + $0x10] sm:$0xff]  ;;  %v35_v53 = vld [vmem:[%s3248_s0 + $0x18] sm:$0xff] }
   0x6   :  { %2356 = vmatmul.mubr.msk.f32.vlgmr.msra.gmra.mxu1 %vm49_vm0, %v37_v3  ;;  %2361 = vmatprep.subr.mxu1 %v2713_v6 }
   0x7   :  { %2362 = vmatpush3.msra.mxu1 %v2783_v4  ;;  %2348 = vmatpush3.msra.mxu0 %v40_v1 }
   0x8   :  { %2349 = vmatprep.mubr.msk.f32.mxu0 %vm49_vm0, %v32_v5  ;;  %2363 = vmatprep.subr.mxu1 %v2713_v6 }
   0x9   :  { %2350 = vmatmul.mubr.msk.f32.vlgmr.msra.gmra.mxu0 %vm49_vm0, %v33_v7  ;;  %2358 = vmatprep.mubr.msk.f32.mxu1 %vm49_vm0, %v38_v8 }
   0xa   :  { %2364 = vmatpush3.msra.mxu1 %v2800_v9  ;;  %2383 = vmatprep.subr.mxu0 %v2713_v6 }
   0xb   :  { %2359 = vmatmul.mubr.msk.f32.gmra.mxu1 %vm49_vm0, %v39_v10  ;;  %2365 = vmatprep.subr.mxu1 %v2713_v6 }
   0xc   :  { %2366 = vmatpush3.msra.mxu1 %v2812_v11  ;;  %2369 = vmatprep.mubr.msk.f32.mxu1 %vm2714_vm1, %v2713_v6 }
   0xd   :  { %2367 = vmatprep.subr.mxu1 %v2713_v6  ;;  %2384 = vmatpush3.msra.mxu0 %v2783_v4 }
   0xe   :  { %2368 = vmatpush3.msra.mxu1 %v2821_v12  ;;  %2385 = vmatprep.subr.mxu0 %v2713_v6 }
   0xf   :  { %2370 = vmatmul.mubr.f32.vlgmr.msra.gmra.mxu1 %v2713_v6  ;;  %2372 = vmatprep.subr.mxu1 %v2713_v6 }
  0x10   :  { %2373 = vmatpush3.msra.mxu1 %v2783_v4  ;;  %2380 = vmatprep.mubr.msk.f32.mxu1 %vm2714_vm1, %v2713_v6 }
  0x11   :  { %2374 = vmatprep.subr.mxu1 %v2713_v6  ;;  %2386 = vmatpush3.msra.mxu0 %v2800_v9 }
  0x12   :  { %2375 = vmatpush3.msra.mxu1 %v2800_v9  ;;  %2387 = vmatprep.subr.mxu0 %v2713_v6 }
  0x13   :  { %2376 = vmatprep.subr.mxu1 %v2713_v6  ;;  %2388 = vmatpush3.msra.mxu0 %v2812_v11 }
  0x14   :  { %2377 = vmatpush3.msra.mxu1 %v2812_v11  ;;  %2389 = vmatprep.subr.mxu0 %v2713_v6 }
  0x15   :  { %2378 = vmatprep.subr.mxu1 %v2713_v6  ;;  %2390 = vmatpush3.msra.mxu0 %v2821_v12 }
  0x16   :  { %2379 = vmatpush3.msra.mxu1 %v2821_v12  ;;  %2405 = vmatprep.subr.mxu0 %v2713_v6 }
  0x17   :  { %2394 = vmatprep.subr.mxu1 %v2713_v6  ;;  %2352 = vmatprep.mubr.msk.f32.mxu0 %vm49_vm0, %v34_v52 }
  0x18   :  { %2353 = vmatmul.mubr.msk.f32.gmra.mxu0 %vm49_vm0, %v35_v53 }
  0x19   :  { %2391 = vmatprep.mubr.msk.f32.mxu0 %vm2714_vm1, %v2713_v6 }
  0xc6   :  { %v2848_v13 = vpop.f32.mrf.mxu1 }
  0xc8   :  { %v2850_v14 = vpop.f32.mrf.mxu1 }
  0xc9   :  { %v2351_v15 = vpop.f32.mrf.mxu0 }
  0xca   :  { %v146_v38 = vadd.f32 %v2351_v15, %v2857_v18 }
  0xcb   :  { %v2852_v16 = vpop.f32.mrf.mxu1  ;;  %v140_v17 = vpop.f32.mrf.mxu0 }
  0xcc   :  { %v141_v20 = vadd.f32 %v2857_v18, %v140_v17 }
  0xcd   :  { %v2859_v19 = vpop.f32.mrf.mxu1 }
  0xcf   :  { %v262_v21 = vpop.f32.mrf.mxu1 }
  0xd0   :  { %v266_v22 = vadd.f32 %v262_v21, %v141_v20 }
  0xd1   :  { %v2371_v23 = vpop.f32.mrf.mxu1 }
  0xd2   :  { %2585 = vtanh.f32 %v266_v22  ;;  %v2183_v25 = vmul.f32 -1.442695, %v266_v22 }
  0xd4   :  { %2587 = vpow2.f32 %v2183_v25 }
  0xd8   :  { %v2354_v58 = vpop.f32.mrf.mxu0 }
  0xda   :  { %v150_v59 = vpop.f32.mrf.mxu0 }
  0xdb   :  { %v151_v60 = vadd.f32 %v2857_v18, %v150_v59 }
  0xdf   :  { %v2586_v24 = vpop.eup %2585 }
  0xe0   :  { %276 = vrot.lane.b32.xlu0 %v2586_v24, %s2715_s12  ;;  %v156_v24 = vadd.f32 %v2354_v58, %v2857_v18 }
  0xe1   :  { %v2588_v26 = vpop.eup %2587 }
  0xe2   :  { %v270_v27 = vadd.f32 1.0, %v2588_v26 }
  0xe4   :  { %2589 = vrcp.f32 %v270_v27 }
  0xf1   :  { %v2590_v28 = vpop.eup %2589 }
  0xf2   :  { %v274_v31 = vmul.f32 0.0, %v2590_v28 }
 0x152   :  { %v277_v29 = vpop.permute.xlu0 %276 }
 0x153   :  { %v279_v30 = vmul.f32 %v2590_v28, %v277_v29 }
 0x155   :  { %281 = vrot.lane.b32.xlu0 %v279_v30, %s2716_s3 }
 0x1c7   :  { %v282_v32 = vpop.permute.xlu0 %281 }
 0x1c8   :  { %v284_v33 = vadd.f32 %v282_v32, %v274_v31 }
 0x1ca   :  { %2591 = vtanh.f32 %v284_v33 }
 0x1d7   :  { %v2592_v34 = vpop.eup %2591 }
 0x1d8   :  { %287 = vrot.lane.b32.xlu1 %v2592_v34, %s2715_s12 }
 0x24a   :  { %v288_v35 = vpop.permute.xlu1 %287 }
 0x24b   :  { %v290_v36 = vmul.f32 %v2590_v28, %v288_v35 }
 0x24d   :  { %292 = vrot.lane.b32.xlu1 %v290_v36, %s2716_s3 }
 0x2bf   :  { %v293_v37 = vpop.permute.xlu1 %292 }
 0x2c0   :  { %295 = vst.msk [vmem:[#allocation3] sm:$0xff] %vm192_vm2, %v293_v37  ;;  %2381 = vmatmul.mubr.msk.f32.vlgmr.msra.gmra.mxu1 %vm192_vm2, %v293_v37 }
 0x2c1   :  { %2395 = vmatpush3.msra.mxu1 %v2783_v4  ;;  %2402 = vmatprep.mubr.msk.f32.mxu1 %vm2714_vm1, %v2713_v6 }
 0x2c2   :  { %2396 = vmatprep.subr.mxu1 %v2713_v6 }
 0x2c3   :  { %2397 = vmatpush3.msra.mxu1 %v2800_v9 }
 0x2c4   :  { %2398 = vmatprep.subr.mxu1 %v2713_v6 }
 0x2c5   :  { %2399 = vmatpush3.msra.mxu1 %v2812_v11 }
 0x2c6   :  { %2400 = vmatprep.subr.mxu1 %v2713_v6 }
 0x2c7   :  { %2401 = vmatpush3.msra.mxu1 %v2821_v12 }
 0x2c8   :  { %2416 = vmatprep.subr.mxu1 %v2713_v6 }
 0x380   :  { %v366_v39 = vpop.f32.mrf.mxu1 }
 0x381   :  { %v370_v40 = vadd.f32 %v366_v39, %v146_v38 }
 0x382   :  { %v2382_v41 = vpop.f32.mrf.mxu1 }
 0x383   :  { %2593 = vtanh.f32 %v370_v40  ;;  %v2185_v43 = vmul.f32 -1.442695, %v370_v40 }
 0x385   :  { %2595 = vpow2.f32 %v2185_v43 }
 0x390   :  { %v2594_v42 = vpop.eup %2593 }
 0x391   :  { %380 = vrot.lane.b32.xlu0 %v2594_v42, %s2715_s12  ;;  %v161_v42 = vadd.f32 %v2857_v18, %v2850_v14 }
 0x392   :  { %v2596_v44 = vpop.eup %2595 }
 0x393   :  { %v374_v45 = vadd.f32 1.0, %v2596_v44 }
 0x395   :  { %2597 = vrcp.f32 %v374_v45 }
 0x3a2   :  { %v2598_v46 = vpop.eup %2597 }
 0x3a3   :  { %v378_v49 = vmul.f32 %v2598_v46, %v284_v33 }
 0x403   :  { %v381_v47 = vpop.permute.xlu0 %380 }
 0x404   :  { %v383_v48 = vmul.f32 %v2598_v46, %v381_v47 }
 0x406   :  { %385 = vrot.lane.b32.xlu1 %v383_v48, %s2716_s3 }
 0x478   :  { %v386_v50 = vpop.permute.xlu1 %385 }
 0x479   :  { %v388_v51 = vadd.f32 %v386_v50, %v378_v49 }
 0x47b   :  { %2599 = vtanh.f32 %v388_v51 }
 0x488   :  { %v2600_v54 = vpop.eup %2599 }
 0x489   :  { %391 = vrot.lane.b32.xlu0 %v2600_v54, %s2715_s12 }
 0x4fb   :  { %v392_v55 = vpop.permute.xlu0 %391 }
 0x4fc   :  { %v394_v56 = vmul.f32 %v2598_v46, %v392_v55 }
 0x4fe   :  { %396 = vrot.lane.b32.xlu1 %v394_v56, %s2716_s3 }
 0x570   :  { %v397_v57 = vpop.permute.xlu1 %396 }
 0x571   :  { %400 = vst.msk [vmem:[#allocation3 + $0x8] sm:$0xff] %vm192_vm2, %v397_v57  ;;  %2392 = vmatmul.mubr.msk.f32.vlgmr.msra.gmra.mxu0 %vm192_vm2, %v397_v57 }
 0x572   :  { %2406 = vmatpush3.msra.mxu0 %v2783_v4  ;;  %2413 = vmatprep.mubr.msk.f32.mxu0 %vm2714_vm1, %v2713_v6 }
 0x573   :  { %2407 = vmatprep.subr.mxu0 %v2713_v6 }
 0x574   :  { %2408 = vmatpush3.msra.mxu0 %v2800_v9 }
 0x575   :  { %2409 = vmatprep.subr.mxu0 %v2713_v6 }
 0x576   :  { %2410 = vmatpush3.msra.mxu0 %v2812_v11 }
 0x577   :  { %2411 = vmatprep.subr.mxu0 %v2713_v6 }
 0x578   :  { %2412 = vmatpush3.msra.mxu0 %v2821_v12 }
 0x579   :  { %2427 = vmatprep.subr.mxu0 %v2713_v6 }
 0x631   :  { %v471_v61 = vpop.f32.mrf.mxu0 }
 0x632   :  { %v475_v62 = vadd.f32 %v471_v61, %v151_v60 }
 0x633   :  { %v2393_v63 = vpop.f32.mrf.mxu0 }
 0x634   :  { %2601 = vtanh.f32 %v475_v62  ;;  %v2187_v1 = vmul.f32 -1.442695, %v475_v62 }
 0x636   :  { %2603 = vpow2.f32 %v2187_v1 }
 0x641   :  { %v2602_v0 = vpop.eup %2601 }
 0x642   :  { %485 = vrot.lane.b32.xlu0 %v2602_v0, %s2715_s12 }
 0x643   :  { %v2604_v2 = vpop.eup %2603 }
 0x644   :  { %v479_v3 = vadd.f32 1.0, %v2604_v2 }
 0x646   :  { %2605 = vrcp.f32 %v479_v3 }
 0x653   :  { %v2606_v5 = vpop.eup %2605 }
 0x654   :  { %v483_v10 = vmul.f32 %v2606_v5, %v388_v51 }
 0x6b4   :  { %v486_v7 = vpop.permute.xlu0 %485 }
 0x6b5   :  { %v488_v8 = vmul.f32 %v2606_v5, %v486_v7 }
 0x6b7   :  { %490 = vrot.lane.b32.xlu1 %v488_v8, %s2716_s3 }
 0x729   :  { %v491_v15 = vpop.permute.xlu1 %490 }
 0x72a   :  { %v493_v17 = vadd.f32 %v491_v15, %v483_v10 }
 0x72c   :  { %2607 = vtanh.f32 %v493_v17 }
 0x739   :  { %v2608_v20 = vpop.eup %2607 }
 0x73a   :  { %496 = vrot.lane.b32.xlu0 %v2608_v20, %s2715_s12  ;;  %v1031_v20 = vld [vmem:[#allocation3] sm:$0xff] }
 0x7ac   :  { %v497_v21 = vpop.permute.xlu0 %496 }
 0x7ad   :  { %v499_v22 = vmul.f32 %v2606_v5, %v497_v21  ;;  %v1042_v5 = vld [vmem:[%s3251_s4 + $0x18] sm:$0xff]  ;;  %v1040_v21 = vld [vmem:[%s3251_s4 + $0x8] sm:$0xff] }
 0x7af   :  { %501 = vrot.lane.b32.xlu1 %v499_v22, %s2716_s3  ;;  %v1039_v22 = vld [vmem:[%s3251_s4] sm:$0xff] }
 0x821   :  { %v502_v23 = vpop.permute.xlu1 %501 }
 0x822   :  { %505 = vst.msk [vmem:[#allocation3 + $0x10] sm:$0xff] %vm192_vm2, %v502_v23  ;;  %2403 = vmatmul.mubr.msk.f32.vlgmr.msra.gmra.mxu1 %vm192_vm2, %v502_v23  ;;  %v1032_v23 = vld [vmem:[#allocation3 + $0x8] sm:$0xff] }
 0x823   :  { %2417 = vmatpush3.msra.mxu1 %v2783_v4  ;;  %2424 = vmatprep.mubr.msk.f32.mxu1 %vm2714_vm1, %v2713_v6 }
 0x824   :  { %2418 = vmatprep.subr.mxu1 %v2713_v6 }
 0x825   :  { %2419 = vmatpush3.msra.mxu1 %v2800_v9 }
 0x826   :  { %2420 = vmatprep.subr.mxu1 %v2713_v6 }
 0x827   :  { %2421 = vmatpush3.msra.mxu1 %v2812_v11 }
 0x828   :  { %2422 = vmatprep.subr.mxu1 %v2713_v6 }
 0x829   :  { %2423 = vmatpush3.msra.mxu1 %v2821_v12 }
 0x82a   :  { %2438 = vmatprep.subr.mxu1 %v2713_v6 }
 0x8e2   :  { %v576_v25 = vpop.f32.mrf.mxu1 }
 0x8e3   :  { %v580_v26 = vadd.f32 %v576_v25, %v156_v24  ;;  %v1033_v24 = vld [vmem:[#allocation3 + $0x10] sm:$0xff] }
 0x8e4   :  { %v2404_v27 = vpop.f32.mrf.mxu1 }
 0x8e5   :  { %2609 = vtanh.f32 %v580_v26  ;;  %v2189_v29 = vmul.f32 -1.442695, %v580_v26 }
 0x8e7   :  { %2611 = vpow2.f32 %v2189_v29 }
 0x8f2   :  { %v2610_v28 = vpop.eup %2609 }
 0x8f3   :  { %590 = vrot.lane.b32.xlu0 %v2610_v28, %s2715_s12  ;;  %v171_v28 = vadd.f32 %v2857_v18, %v2859_v19 }
 0x8f4   :  { %v2612_v30 = vpop.eup %2611 }
 0x8f5   :  { %v584_v31 = vadd.f32 1.0, %v2612_v30 }
 0x8f7   :  { %2613 = vrcp.f32 %v584_v31 }
 0x904   :  { %v2614_v32 = vpop.eup %2613 }
 0x905   :  { %v588_v35 = vmul.f32 %v2614_v32, %v493_v17  ;;  %v1041_v17 = vld [vmem:[%s3251_s4 + $0x10] sm:$0xff] }
 0x965   :  { %v591_v33 = vpop.permute.xlu0 %590 }
 0x966   :  { %v593_v34 = vmul.f32 %v2614_v32, %v591_v33 }
 0x968   :  { %595 = vrot.lane.b32.xlu1 %v593_v34, %s2716_s3 }
 0x9da   :  { %v596_v36 = vpop.permute.xlu1 %595 }
 0x9db   :  { %v598_v37 = vadd.f32 %v596_v36, %v588_v35 }
 0x9dd   :  { %2615 = vtanh.f32 %v598_v37 }
 0x9ea   :  { %v2616_v38 = vpop.eup %2615 }
 0x9eb   :  { %601 = vrot.lane.b32.xlu0 %v2616_v38, %s2715_s12 }
 0xa5d   :  { %v602_v39 = vpop.permute.xlu0 %601 }
 0xa5e   :  { %v604_v40 = vmul.f32 %v2614_v32, %v602_v39 }
 0xa60   :  { %606 = vrot.lane.b32.xlu1 %v604_v40, %s2716_s3 }
 0xad2   :  { %v607_v41 = vpop.permute.xlu1 %606 }
 0xad3   :  { %610 = vst.msk [vmem:[#allocation3 + $0x18] sm:$0xff] %vm192_vm2, %v607_v41  ;;  %2414 = vmatmul.mubr.msk.f32.vlgmr.msra.gmra.mxu0 %vm192_vm2, %v607_v41 }
 0xad4   :  { %2428 = vmatpush3.msra.mxu0 %v2783_v4  ;;  %2435 = vmatprep.mubr.msk.f32.mxu0 %vm2714_vm1, %v2713_v6 }
 0xad5   :  { %2429 = vmatprep.subr.mxu0 %v2713_v6 }
 0xad6   :  { %2430 = vmatpush3.msra.mxu0 %v2800_v9 }
 0xad7   :  { %2431 = vmatprep.subr.mxu0 %v2713_v6 }
 0xad8   :  { %2432 = vmatpush3.msra.mxu0 %v2812_v11 }
 0xad9   :  { %2433 = vmatprep.subr.mxu0 %v2713_v6 }
 0xada   :  { %2434 = vmatpush3.msra.mxu0 %v2821_v12  ;;  %v1034_v25 = vld [vmem:[#allocation3 + $0x18] sm:$0xff] }
 0xadb   :  { %2449 = vmatprep.subr.mxu0 %v1042_v5 }
 0xb93   :  { %v681_v43 = vpop.f32.mrf.mxu0 }
 0xb94   :  { %v685_v44 = vadd.f32 %v681_v43, %v161_v42  ;;  %v2994_v42 = vld [vmem:[%s3252_s5 + $0x18] sm:$0xff]  ;;  %v3000_v43 = vld [vmem:[%s3252_s5 + $0x10] sm:$0xff] }
 0xb95   :  { %v2415_v45 = vpop.f32.mrf.mxu0 }
 0xb96   :  { %2617 = vtanh.f32 %v685_v44  ;;  %v2191_v47 = vmul.f32 -1.442695, %v685_v44  ;;  %v3007_v44 = vld [vmem:[%s3252_s5 + $0x8] sm:$0xff]  ;;  %v3014_v45 = vld [vmem:[%s3252_s5] sm:$0xff] }
 0xb98   :  { %2619 = vpow2.f32 %v2191_v47 }
 0xba3   :  { %v2618_v46 = vpop.eup %2617 }
 0xba4   :  { %695 = vrot.lane.b32.xlu0 %v2618_v46, %s2715_s12 }
 0xba5   :  { %v2620_v48 = vpop.eup %2619 }
 0xba6   :  { %v689_v49 = vadd.f32 1.0, %v2620_v48 }
 0xba8   :  { %2621 = vrcp.f32 %v689_v49 }
 0xbb5   :  { %v2622_v50 = vpop.eup %2621 }
 0xbb6   :  { %v693_v53 = vmul.f32 %v2622_v50, %v598_v37 }
 0xc16   :  { %v696_v51 = vpop.permute.xlu0 %695 }
 0xc17   :  { %v698_v52 = vmul.f32 %v2622_v50, %v696_v51 }
 0xc19   :  { %700 = vrot.lane.b32.xlu1 %v698_v52, %s2716_s3 }
 0xc8b   :  { %v701_v54 = vpop.permute.xlu1 %700 }
 0xc8c   :  { %v703_v14 = vadd.f32 %v701_v54, %v693_v53 }
 0xc8e   :  { %2623 = vtanh.f32 %v703_v14 }
 0xc9b   :  { %v2624_v55 = vpop.eup %2623 }
 0xc9c   :  { %706 = vrot.lane.b32.xlu0 %v2624_v55, %s2715_s12  ;;  %v3051_v55 = vld [vmem:[%s3253_s6] ss:$0 sm:$0xff] }
 0xd0e   :  { %v707_v56 = vpop.permute.xlu0 %706 }
 0xd0f   :  { %v709_v57 = vmul.f32 %v2622_v50, %v707_v56  ;;  %v176_v50 = vadd.f32 %v2852_v16, %v2857_v18 }
 0xd11   :  { %711 = vrot.lane.b32.xlu1 %v709_v57, %s2716_s3 }
 0xd83   :  { %v712_v58 = vpop.permute.xlu1 %711 }
 0xd84   :  { %715 = vst.msk [vmem:[#allocation3 + $0x20] sm:$0xff] %vm192_vm2, %v712_v58  ;;  %2425 = vmatmul.mubr.msk.f32.vlgmr.msra.gmra.mxu1 %vm192_vm2, %v712_v58 }
 0xd85   :  { %2439 = vmatpush3.msra.mxu1 %v2783_v4  ;;  %2446 = vmatprep.mubr.msk.f32.mxu1 %vm2714_vm1, %v2713_v6  ;;  %v166_v4 = vadd.f32 %v2848_v13, %v2857_v18 }
 0xd86   :  { %2440 = vmatprep.subr.mxu1 %v2713_v6 }
 0xd87   :  { %2441 = vmatpush3.msra.mxu1 %v2800_v9 }
 0xd88   :  { %2442 = vmatprep.subr.mxu1 %v2713_v6 }
 0xd89   :  { %2443 = vmatpush3.msra.mxu1 %v2812_v11 }
 0xd8a   :  { %2444 = vmatprep.subr.mxu1 %v2713_v6 }
 0xd8b   :  { %2445 = vmatpush3.msra.mxu1 %v2821_v12  ;;  %v1035_v26 = vld [vmem:[#allocation3 + $0x20] sm:$0xff] }
 0xd8c   :  { %2469 = vmatprep.subr.mxu1 %v2713_v6 }
 0xe44   :  { %v786_v59 = vpop.f32.mrf.mxu1 }
 0xe45   :  { %v790_v60 = vadd.f32 %v786_v59, %v166_v4 }
 0xe46   :  { %v2426_v61 = vpop.f32.mrf.mxu1 }
 0xe47   :  { %2625 = vtanh.f32 %v790_v60  ;;  %v2193_v9 = vmul.f32 -1.442695, %v790_v60 }
 0xe49   :  { %2627 = vpow2.f32 %v2193_v9 }
 0xe54   :  { %v2626_v62 = vpop.eup %2625 }
 0xe55   :  { %800 = vrot.lane.b32.xlu0 %v2626_v62, %s2715_s12 }
 0xe56   :  { %v2628_v63 = vpop.eup %2627 }
 0xe57   :  { %v794_v11 = vadd.f32 1.0, %v2628_v63 }
 0xe59   :  { %2629 = vrcp.f32 %v794_v11 }
 0xe66   :  { %v2630_v0 = vpop.eup %2629 }
 0xe67   :  { %v798_v2 = vmul.f32 %v2630_v0, %v703_v14 }
 0xec7   :  { %v801_v1 = vpop.permute.xlu0 %800 }
 0xec8   :  { %v803_v12 = vmul.f32 %v2630_v0, %v801_v1 }
 0xeca   :  { %805 = vrot.lane.b32.xlu1 %v803_v12, %s2716_s3 }
 0xf3c   :  { %v806_v3 = vpop.permute.xlu1 %805 }
 0xf3d   :  { %v808_v13 = vadd.f32 %v806_v3, %v798_v2 }
 0xf3f   :  { %2631 = vtanh.f32 %v808_v13 }
 0xf4c   :  { %v2632_v7 = vpop.eup %2631 }
 0xf4d   :  { %811 = vrot.lane.b32.xlu0 %v2632_v7, %s2715_s12 }
 0xfbf   :  { %v812_v8 = vpop.permute.xlu0 %811 }
 0xfc0   :  { %v814_v10 = vmul.f32 %v2630_v0, %v812_v8 }
 0xfc2   :  { %816 = vrot.lane.b32.xlu1 %v814_v10, %s2716_s3 }
0x1034   :  { %v817_v15 = vpop.permute.xlu1 %816 }
0x1035   :  { %820 = vst.msk [vmem:[#allocation3 + $0x28] sm:$0xff] %vm192_vm2, %v817_v15  ;;  %2436 = vmatmul.mubr.msk.f32.vlgmr.msra.gmra.mxu0 %vm192_vm2, %v817_v15 }
0x1036   :  { %2450 = vmatpush3.msra.mxu0 %v1042_v5  ;;  %2457 = vmatprep.mubr.msk.f32.mxu0 %vm192_vm2, %v1031_v20 }
0x1037   :  { %2451 = vmatprep.subr.mxu0 %v1041_v17 }
0x1038   :  { %2452 = vmatpush3.msra.mxu0 %v1041_v17 }
0x1039   :  { %2453 = vmatprep.subr.mxu0 %v1040_v21 }
0x103a   :  { %2454 = vmatpush3.msra.mxu0 %v1040_v21 }
0x103b   :  { %2455 = vmatprep.subr.mxu0 %v1039_v22 }
0x103c   :  { %2456 = vmatpush3.msra.mxu0 %v1039_v22  ;;  %v1036_v27 = vld [vmem:[#allocation3 + $0x28] sm:$0xff] }
0x103d   :  { %2458 = vmatmul.mubr.msk.f32.vlgmr.msra.gmra.mxu0 %vm192_vm2, %v1032_v23  ;;  %2491 = vmatprep.subr.mxu0 %v2713_v6 }
0x103e   :  { %2460 = vmatprep.mubr.msk.f32.mxu0 %vm192_vm2, %v1033_v24  ;;  %2492 = vmatpush3.msra.mxu0 %v2994_v42 }
0x103f   :  { %2493 = vmatprep.subr.mxu0 %v2713_v6 }
0x1040   :  { %2494 = vmatpush3.msra.mxu0 %v3000_v43 }
0x1041   :  { %2461 = vmatmul.mubr.msk.f32.gmra.mxu0 %vm192_vm2, %v1034_v25  ;;  %2495 = vmatprep.subr.mxu0 %v2713_v6 }
0x1042   :  { %2463 = vmatprep.mubr.msk.f32.mxu0 %vm192_vm2, %v1035_v26  ;;  %2496 = vmatpush3.msra.mxu0 %v3007_v44 }
0x1043   :  { %2497 = vmatprep.subr.mxu0 %v2713_v6 }
0x1044   :  { %2498 = vmatpush3.msra.mxu0 %v3014_v45 }
0x1045   :  { %2464 = vmatmul.mubr.msk.f32.gmra.mxu0 %vm192_vm2, %v1036_v27  ;;  %2513 = vmatprep.subr.mxu0 %v2713_v6 }
0x10f5   :  { %v891_v29 = vpop.f32.mrf.mxu0 }
0x10f6   :  { %v895_v30 = vadd.f32 %v891_v29, %v171_v28 }
0x10f7   :  { %v2437_v31 = vpop.f32.mrf.mxu0 }
0x10f8   :  { %2633 = vtanh.f32 %v895_v30  ;;  %v2195_v33 = vmul.f32 -1.442695, %v895_v30 }
0x10fa   :  { %2635 = vpow2.f32 %v2195_v33 }
0x10fd   :  { %v3046_v51 = vpop.f32.mrf.mxu0 }
0x10fe   :  { %v1146_v26 = vadd.f32 %v3046_v51, %v3051_v55 }
0x10ff   :  { %v1140_v14 = vpop.f32.mrf.mxu0 }
0x1100   :  { %v1141_v56 = vadd.f32 %v3051_v55, %v1140_v14 }
0x1105   :  { %v2634_v32 = vpop.eup %2633 }
0x1106   :  { %905 = vrot.lane.b32.xlu0 %v2634_v32, %s2715_s12 }
0x1107   :  { %v2636_v34 = vpop.eup %2635 }
0x1108   :  { %v899_v35 = vadd.f32 1.0, %v2636_v34 }
0x110a   :  { %2637 = vrcp.f32 %v899_v35 }
0x1117   :  { %v2638_v36 = vpop.eup %2637 }
0x1118   :  { %v903_v39 = vmul.f32 %v2638_v36, %v808_v13 }
0x1178   :  { %v906_v37 = vpop.permute.xlu0 %905 }
0x1179   :  { %v908_v38 = vmul.f32 %v2638_v36, %v906_v37 }
0x117b   :  { %910 = vrot.lane.b32.xlu1 %v908_v38, %s2716_s3 }
0x11ed   :  { %v911_v40 = vpop.permute.xlu1 %910 }
0x11ee   :  { %v2987_v19 = vadd.f32 %v911_v40, %v903_v39 }
0x11f0   :  { %2639 = vtanh.f32 %v2987_v19 }
0x11fd   :  { %v2640_v41 = vpop.eup %2639 }
0x11fe   :  { %916 = vrot.lane.b32.xlu0 %v2640_v41, %s2715_s12 }
0x1270   :  { %v917_v46 = vpop.permute.xlu0 %916 }
0x1271   :  { %v919_v47 = vmul.f32 %v2638_v36, %v917_v46 }
0x1273   :  { %921 = vrot.lane.b32.xlu1 %v919_v47, %s2716_s3 }
0x12e5   :  { %v922_v48 = vpop.permute.xlu1 %921 }
0x12e6   :  { %925 = vst.msk [vmem:[#allocation3 + $0x30] sm:$0xff] %vm192_vm2, %v922_v48  ;;  %2447 = vmatmul.mubr.msk.f32.vlgmr.msra.gmra.mxu1 %vm192_vm2, %v922_v48 }
0x12e7   :  { %2470 = vmatpush3.msra.mxu1 %v2994_v42  ;;  %2477 = vmatprep.mubr.msk.f32.mxu1 %vm2714_vm1, %v2713_v6 }
0x12e8   :  { %2471 = vmatprep.subr.mxu1 %v2713_v6 }
0x12e9   :  { %2472 = vmatpush3.msra.mxu1 %v3000_v43 }
0x12ea   :  { %2473 = vmatprep.subr.mxu1 %v2713_v6 }
0x12eb   :  { %2474 = vmatpush3.msra.mxu1 %v3007_v44 }
0x12ec   :  { %2475 = vmatprep.subr.mxu1 %v2713_v6 }
0x12ed   :  { %2476 = vmatpush3.msra.mxu1 %v3014_v45  ;;  %v1037_v49 = vld [vmem:[#allocation3 + $0x30] sm:$0xff] }
0x12ee   :  { %2478 = vmatmul.mubr.f32.vlgmr.msra.gmra.mxu1 %v2713_v6  ;;  %2466 = vmatprep.mubr.msk.f32.mxu0 %vm192_vm2, %v1037_v49  ;;  %v2462_v49 = vpop.f32.mrf.mxu0 }
0x12ef   :  { %2480 = vmatprep.subr.mxu1 %v2713_v6  ;;  %2488 = vmatprep.mubr.msk.f32.mxu1 %vm2714_vm1, %v2713_v6 }
0x12f0   :  { %2481 = vmatpush3.msra.mxu1 %v2994_v42 }
0x12f1   :  { %2482 = vmatprep.subr.mxu1 %v2713_v6 }
0x12f2   :  { %2483 = vmatpush3.msra.mxu1 %v3000_v43 }
0x12f3   :  { %2484 = vmatprep.subr.mxu1 %v2713_v6 }
0x12f4   :  { %2485 = vmatpush3.msra.mxu1 %v3007_v44 }
0x12f5   :  { %2486 = vmatprep.subr.mxu1 %v2713_v6 }
0x12f6   :  { %2487 = vmatpush3.msra.mxu1 %v3014_v45 }
0x12f7   :  { %2502 = vmatprep.subr.mxu1 %v2713_v6 }
0x13a6   :  { %v996_v52 = vpop.f32.mrf.mxu1 }
0x13a7   :  { %v1000_v53 = vadd.f32 %v996_v52, %v176_v50  ;;  %v1150_v50 = vpop.f32.mrf.mxu0 }
0x13a8   :  { %v2448_v54 = vpop.f32.mrf.mxu1  ;;  %v1151_v14 = vadd.f32 %v3051_v55, %v1150_v50 }
0x13a9   :  { %v2197_v2 = vmul.f32 -1.442695, %v1000_v53  ;;  %v3097_v51 = vpop.f32.mrf.mxu0 }
0x13ab   :  { %v3099_v52 = vpop.f32.mrf.mxu0 }
0x13ae   :  { %v1258_v57 = vpop.f32.mrf.mxu1 }
0x13af   :  { %v1262_v58 = vadd.f32 %v1258_v57, %v1141_v56 }
0x13b0   :  { %v2479_v4 = vpop.f32.mrf.mxu1 }
0x13b1   :  { %2641 = vtanh.f32 %v1262_v58  ;;  %v2207_v16 = vmul.f32 -1.442695, %v1262_v58 }
0x13b3   :  { %2643 = vpow2.f32 %v2207_v16 }
0x13be   :  { %v2642_v59 = vpop.eup %2641 }
0x13bf   :  { %1272 = vrot.lane.b32.xlu0 %v2642_v59, %s2715_s12 }
0x13c0   :  { %v2644_v18 = vpop.eup %2643 }
0x13c1   :  { %v1266_v60 = vadd.f32 1.0, %v2644_v18 }
0x13c3   :  { %2645 = vrcp.f32 %v1266_v60 }
0x13d0   :  { %v2646_v61 = vpop.eup %2645 }
0x13d1   :  { %v1270_v63 = vmul.f32 0.0, %v2646_v61 }
0x1431   :  { %v1273_v62 = vpop.permute.xlu0 %1272 }
0x1432   :  { %v1275_v9 = vmul.f32 %v2646_v61, %v1273_v62 }
0x1434   :  { %1277 = vrot.lane.b32.xlu1 %v1275_v9, %s2716_s3 }
0x14a6   :  { %v1278_v11 = vpop.permute.xlu1 %1277 }
0x14a7   :  { %v1280_v0 = vadd.f32 %v1278_v11, %v1270_v63 }
0x14a9   :  { %2647 = vtanh.f32 %v1280_v0 }
0x14aa   :  { %2649 = vtanh.f32 %v1000_v53 }
0x14ab   :  { %2651 = vpow2.f32 %v2197_v2 }
0x14b6   :  { %v2648_v1 = vpop.eup %2647 }
0x14b7   :  { %1283 = vrot.lane.b32.xlu0 %v2648_v1, %s2715_s12  ;;  %v2650_v12 = vpop.eup %2649 }
0x14b8   :  { %v2652_v3 = vpop.eup %2651 }
0x14b9   :  { %v1004_v13 = vadd.f32 1.0, %v2652_v3  ;;  %v1156_v3 = vadd.f32 %v2462_v49, %v3051_v55 }
0x14bb   :  { %1010 = vrot.lane.b32.xlu0 %v2650_v12, %s2715_s12  ;;  %2653 = vrcp.f32 %v1004_v13 }
0x14c8   :  { %v2654_v8 = vpop.eup %2653 }
0x14c9   :  { %v1008_v20 = vmul.f32 %v2654_v8, %v2987_v19 }
0x1529   :  { %v1284_v5 = vpop.permute.xlu0 %1283 }
0x152a   :  { %v1286_v7 = vmul.f32 %v2646_v61, %v1284_v5 }
0x152c   :  { %1288 = vrot.lane.b32.xlu1 %v1286_v7, %s2716_s3 }
0x152d   :  { %v1011_v10 = vpop.permute.xlu0 %1010 }
0x152e   :  { %v1013_v15 = vmul.f32 %v2654_v8, %v1011_v10 }
0x1530   :  { %1015 = vrot.lane.b32.xlu0 %v1013_v15, %s2716_s3 }
0x159e   :  { %v1289_v17 = vpop.permute.xlu1 %1288 }
0x159f   :  { %1291 = vst.msk [vmem:[#allocation3] sm:$0xff] %vm192_vm2, %v1289_v17  ;;  %2489 = vmatmul.mubr.msk.f32.vlgmr.msra.gmra.mxu1 %vm192_vm2, %v1289_v17 }
0x15a0   :  { %2503 = vmatpush3.msra.mxu1 %v2994_v42  ;;  %2510 = vmatprep.mubr.msk.f32.mxu1 %vm2714_vm1, %v2713_v6 }
0x15a1   :  { %2504 = vmatprep.subr.mxu1 %v2713_v6 }
0x15a2   :  { %v1016_v21 = vpop.permute.xlu0 %1015  ;;  %2505 = vmatpush3.msra.mxu1 %v3000_v43 }
0x15a3   :  { %v1018_v22 = vadd.f32 %v1016_v21, %v1008_v20  ;;  %2506 = vmatprep.subr.mxu1 %v2713_v6 }
0x15a4   :  { %2507 = vmatpush3.msra.mxu1 %v3007_v44 }
0x15a5   :  { %2655 = vtanh.f32 %v1018_v22  ;;  %2508 = vmatprep.subr.mxu1 %v2713_v6 }
0x15a6   :  { %2509 = vmatpush3.msra.mxu1 %v3014_v45 }
0x15a7   :  { %2524 = vmatprep.subr.mxu1 %v2713_v6 }
0x15b2   :  { %v2656_v23 = vpop.eup %2655 }
0x15b3   :  { %1021 = vrot.lane.b32.xlu0 %v2656_v23, %s2715_s12 }
0x1625   :  { %v1022_v24 = vpop.permute.xlu0 %1021 }
0x1626   :  { %v1024_v25 = vmul.f32 %v2654_v8, %v1022_v24 }
0x1628   :  { %1026 = vrot.lane.b32.xlu0 %v1024_v25, %s2716_s3 }
0x165f   :  { %v1361_v27 = vpop.f32.mrf.mxu1 }
0x1660   :  { %v1365_v28 = vadd.f32 %v1361_v27, %v1146_v26 }
0x1661   :  { %v2490_v29 = vpop.f32.mrf.mxu1 }
0x1662   :  { %2657 = vtanh.f32 %v1365_v28  ;;  %v2209_v33 = vmul.f32 -1.442695, %v1365_v28 }
0x1664   :  { %2659 = vpow2.f32 %v2209_v33 }
0x166f   :  { %v2658_v30 = vpop.eup %2657 }
0x1670   :  { %1375 = vrot.lane.b32.xlu1 %v2658_v30, %s2715_s12  ;;  %v1161_v30 = vadd.f32 %v3051_v55, %v3099_v52  ;;  %v1166_v52 = vadd.f32 %v3097_v51, %v3051_v55 }
0x1671   :  { %v2660_v34 = vpop.eup %2659 }
0x1672   :  { %v1369_v35 = vadd.f32 1.0, %v2660_v34 }
0x1674   :  { %2661 = vrcp.f32 %v1369_v35 }
0x1681   :  { %v2662_v36 = vpop.eup %2661 }
0x1682   :  { %v1373_v39 = vmul.f32 %v2662_v36, %v1280_v0 }
0x169a   :  { %v1027_v31 = vpop.permute.xlu0 %1026 }
0x169b   :  { %1030 = vst.msk [vmem:[#allocation3 + $0x38] sm:$0xff] %vm192_vm2, %v1027_v31 }
0x16a2   :  { %v1038_v32 = vld [vmem:[#allocation3 + $0x38] sm:$0xff] }
0x16a3   :  { %2467 = vmatmul.mubr.msk.f32.gmra.mxu0 %vm192_vm2, %v1038_v32 }
0x16a4   :  { %2499 = vmatprep.mubr.msk.f32.mxu0 %vm2714_vm1, %v2713_v6 }
0x16e2   :  { %v1376_v37 = vpop.permute.xlu1 %1375 }
0x16e3   :  { %v1378_v38 = vmul.f32 %v2662_v36, %v1376_v37 }
0x16e5   :  { %1380 = vrot.lane.b32.xlu1 %v1378_v38, %s2716_s3 }
0x1757   :  { %v1381_v40 = vpop.permute.xlu1 %1380 }
0x1758   :  { %v1383_v19 = vadd.f32 %v1381_v40, %v1373_v39 }
0x175a   :  { %2663 = vtanh.f32 %v1383_v19 }
0x1763   :  { %v3101_v53 = vpop.f32.mrf.mxu0 }
0x1765   :  { %v3103_v54 = vpop.f32.mrf.mxu0 }
0x1767   :  { %v2664_v41 = vpop.eup %2663 }
0x1768   :  { %1386 = vrot.lane.b32.xlu1 %v2664_v41, %s2715_s12 }
0x17da   :  { %v1387_v46 = vpop.permute.xlu1 %1386 }
0x17db   :  { %v1389_v47 = vmul.f32 %v2662_v36, %v1387_v46 }
0x17dd   :  { %1391 = vrot.lane.b32.xlu1 %v1389_v47, %s2716_s3 }
0x184f   :  { %v1392_v48 = vpop.permute.xlu1 %1391 }
0x1850   :  { %1394 = vst.msk [vmem:[#allocation3 + $0x8] sm:$0xff] %vm192_vm2, %v1392_v48  ;;  %2500 = vmatmul.mubr.msk.f32.vlgmr.msra.gmra.mxu0 %vm192_vm2, %v1392_v48 }
0x1851   :  { %2514 = vmatpush3.msra.mxu0 %v2994_v42  ;;  %2521 = vmatprep.mubr.msk.f32.mxu0 %vm2714_vm1, %v2713_v6 }
0x1852   :  { %2515 = vmatprep.subr.mxu0 %v2713_v6 }
0x1853   :  { %2516 = vmatpush3.msra.mxu0 %v3000_v43 }
0x1854   :  { %2517 = vmatprep.subr.mxu0 %v2713_v6 }
0x1855   :  { %2518 = vmatpush3.msra.mxu0 %v3007_v44 }
0x1856   :  { %2519 = vmatprep.subr.mxu0 %v2713_v6 }
0x1857   :  { %2520 = vmatpush3.msra.mxu0 %v3014_v45 }
0x1858   :  { %2535 = vmatprep.subr.mxu0 %v2713_v6 }
0x1910   :  { %v1464_v56 = vpop.f32.mrf.mxu0 }
0x1911   :  { %v1468_v57 = vadd.f32 %v1464_v56, %v1151_v14 }
0x1912   :  { %v2501_v58 = vpop.f32.mrf.mxu0 }
0x1913   :  { %2665 = vtanh.f32 %v1468_v57  ;;  %v2211_v59 = vmul.f32 -1.442695, %v1468_v57 }
0x1915   :  { %2667 = vpow2.f32 %v2211_v59 }
0x1920   :  { %v2666_v4 = vpop.eup %2665 }
0x1921   :  { %1478 = vrot.lane.b32.xlu0 %v2666_v4, %s2715_s12 }
0x1922   :  { %v2668_v16 = vpop.eup %2667 }
0x1923   :  { %v1472_v18 = vadd.f32 1.0, %v2668_v16 }
0x1925   :  { %2669 = vrcp.f32 %v1472_v18  ;;  %v2024_v18 = vld [vmem:[%s3254_s7 + $0x18] sm:$0xff] }
0x1932   :  { %v2670_v60 = vpop.eup %2669 }
0x1933   :  { %v1476_v9 = vmul.f32 %v2670_v60, %v1383_v19 }
0x1993   :  { %v1479_v61 = vpop.permute.xlu0 %1478 }
0x1994   :  { %v1481_v62 = vmul.f32 %v2670_v60, %v1479_v61 }
0x1996   :  { %1483 = vrot.lane.b32.xlu1 %v1481_v62, %s2716_s3 }
0x1a08   :  { %v1484_v63 = vpop.permute.xlu1 %1483 }
0x1a09   :  { %v1486_v11 = vadd.f32 %v1484_v63, %v1476_v9  ;;  %v2023_v63 = vld [vmem:[%s3254_s7 + $0x10] sm:$0xff] }
0x1a0b   :  { %2671 = vtanh.f32 %v1486_v11 }
0x1a18   :  { %v2672_v0 = vpop.eup %2671 }
0x1a19   :  { %1489 = vrot.lane.b32.xlu0 %v2672_v0, %s2715_s12  ;;  %v2022_v0 = vld [vmem:[%s3254_s7 + $0x8] sm:$0xff] }
0x1a8b   :  { %v1490_v1 = vpop.permute.xlu0 %1489 }
0x1a8c   :  { %v1492_v12 = vmul.f32 %v2670_v60, %v1490_v1  ;;  %v2021_v1 = vld [vmem:[%s3254_s7] sm:$0xff] }
0x1a8e   :  { %1494 = vrot.lane.b32.xlu1 %v1492_v12, %s2716_s3  ;;  %v2014_v12 = vld [vmem:[#allocation3 + $0x8] sm:$0xff] }
0x1b00   :  { %v1495_v2 = vpop.permute.xlu1 %1494 }
0x1b01   :  { %1497 = vst.msk [vmem:[#allocation3 + $0x10] sm:$0xff] %vm192_vm2, %v1495_v2  ;;  %2511 = vmatmul.mubr.msk.f32.vlgmr.msra.gmra.mxu1 %vm192_vm2, %v1495_v2 }
0x1b02   :  { %2525 = vmatpush3.msra.mxu1 %v2994_v42  ;;  %2532 = vmatprep.mubr.msk.f32.mxu1 %vm2714_vm1, %v2713_v6 }
0x1b03   :  { %2526 = vmatprep.subr.mxu1 %v2713_v6 }
0x1b04   :  { %2527 = vmatpush3.msra.mxu1 %v3000_v43 }
0x1b05   :  { %2528 = vmatprep.subr.mxu1 %v2713_v6 }
0x1b06   :  { %2529 = vmatpush3.msra.mxu1 %v3007_v44 }
0x1b07   :  { %2530 = vmatprep.subr.mxu1 %v2713_v6 }
0x1b08   :  { %2531 = vmatpush3.msra.mxu1 %v3014_v45  ;;  %v2015_v2 = vld [vmem:[#allocation3 + $0x10] sm:$0xff] }
0x1b09   :  { %2546 = vmatprep.subr.mxu1 %v2713_v6 }
0x1bc1   :  { %v1567_v13 = vpop.f32.mrf.mxu1 }
0x1bc2   :  { %v1571_v5 = vadd.f32 %v1567_v13, %v1156_v3 }
0x1bc3   :  { %v2512_v7 = vpop.f32.mrf.mxu1 }
0x1bc4   :  { %2673 = vtanh.f32 %v1571_v5  ;;  %v2213_v10 = vmul.f32 -1.442695, %v1571_v5  ;;  %v1171_v7 = vadd.f32 %v3051_v55, %v3103_v54 }
0x1bc6   :  { %2675 = vpow2.f32 %v2213_v10 }
0x1bd1   :  { %v2674_v8 = vpop.eup %2673 }
0x1bd2   :  { %1581 = vrot.lane.b32.xlu0 %v2674_v8, %s2715_s12 }
0x1bd3   :  { %v2676_v15 = vpop.eup %2675 }
0x1bd4   :  { %v1575_v17 = vadd.f32 1.0, %v2676_v15 }
0x1bd6   :  { %2677 = vrcp.f32 %v1575_v17  ;;  %v3189_v17 = vld [vmem:[%s3255_s8] ss:$0 sm:$0xff] }
0x1be3   :  { %v2678_v20 = vpop.eup %2677 }
0x1be4   :  { %v1579_v23 = vmul.f32 %v2678_v20, %v1486_v11  ;;  %v2013_v11 = vld [vmem:[#allocation3] sm:$0xff] }
0x1c44   :  { %v1582_v21 = vpop.permute.xlu0 %1581 }
0x1c45   :  { %v1584_v22 = vmul.f32 %v2678_v20, %v1582_v21 }
0x1c47   :  { %1586 = vrot.lane.b32.xlu1 %v1584_v22, %s2716_s3 }
0x1cb9   :  { %v1587_v24 = vpop.permute.xlu1 %1586 }
0x1cba   :  { %v1589_v25 = vadd.f32 %v1587_v24, %v1579_v23 }
0x1cbc   :  { %2679 = vtanh.f32 %v1589_v25 }
0x1cc9   :  { %v2680_v26 = vpop.eup %2679 }
0x1cca   :  { %1592 = vrot.lane.b32.xlu0 %v2680_v26, %s2715_s12 }
0x1d3c   :  { %v1593_v27 = vpop.permute.xlu0 %1592 }
0x1d3d   :  { %v1595_v28 = vmul.f32 %v2678_v20, %v1593_v27 }
0x1d3f   :  { %1597 = vrot.lane.b32.xlu1 %v1595_v28, %s2716_s3 }
0x1db1   :  { %v1598_v29 = vpop.permute.xlu1 %1597 }
0x1db2   :  { %1600 = vst.msk [vmem:[#allocation3 + $0x18] sm:$0xff] %vm192_vm2, %v1598_v29  ;;  %2522 = vmatmul.mubr.msk.f32.vlgmr.msra.gmra.mxu0 %vm192_vm2, %v1598_v29 }
0x1db3   :  { %2536 = vmatpush3.msra.mxu0 %v2994_v42  ;;  %2543 = vmatprep.mubr.msk.f32.mxu0 %vm2714_vm1, %v2713_v6 }
0x1db4   :  { %2537 = vmatprep.subr.mxu0 %v2713_v6 }
0x1db5   :  { %2538 = vmatpush3.msra.mxu0 %v3000_v43 }
0x1db6   :  { %2539 = vmatprep.subr.mxu0 %v2713_v6 }
0x1db7   :  { %2540 = vmatpush3.msra.mxu0 %v3007_v44 }
0x1db8   :  { %2541 = vmatprep.subr.mxu0 %v2713_v6 }
0x1db9   :  { %2542 = vmatpush3.msra.mxu0 %v3014_v45  ;;  %v2016_v3 = vld [vmem:[#allocation3 + $0x18] sm:$0xff] }
0x1dba   :  { %2557 = vmatprep.subr.mxu0 %v2024_v18 }
0x1e72   :  { %v1670_v31 = vpop.f32.mrf.mxu0 }
0x1e73   :  { %v1674_v32 = vadd.f32 %v1670_v31, %v1161_v30 }
0x1e74   :  { %v2523_v33 = vpop.f32.mrf.mxu0 }
0x1e75   :  { %2681 = vtanh.f32 %v1674_v32  ;;  %v2215_v35 = vmul.f32 -1.442695, %v1674_v32 }
0x1e77   :  { %2683 = vpow2.f32 %v2215_v35 }
0x1e82   :  { %v2682_v34 = vpop.eup %2681 }
0x1e83   :  { %1684 = vrot.lane.b32.xlu0 %v2682_v34, %s2715_s12 }
0x1e84   :  { %v2684_v36 = vpop.eup %2683 }
0x1e85   :  { %v1678_v37 = vadd.f32 1.0, %v2684_v36 }
0x1e87   :  { %2685 = vrcp.f32 %v1678_v37 }
0x1e94   :  { %v2686_v38 = vpop.eup %2685 }
0x1e95   :  { %v1682_v19 = vmul.f32 %v2686_v38, %v1589_v25 }
0x1ef5   :  { %v1685_v39 = vpop.permute.xlu0 %1684 }
0x1ef6   :  { %v1687_v40 = vmul.f32 %v2686_v38, %v1685_v39 }
0x1ef8   :  { %1689 = vrot.lane.b32.xlu1 %v1687_v40, %s2716_s3 }
0x1f6a   :  { %v1690_v41 = vpop.permute.xlu1 %1689 }
0x1f6b   :  { %v1692_v46 = vadd.f32 %v1690_v41, %v1682_v19 }
0x1f6d   :  { %2687 = vtanh.f32 %v1692_v46 }
0x1f7a   :  { %v2688_v47 = vpop.eup %2687 }
0x1f7b   :  { %1695 = vrot.lane.b32.xlu0 %v2688_v47, %s2715_s12 }
0x1fed   :  { %v1696_v48 = vpop.permute.xlu0 %1695 }
0x1fee   :  { %v1698_v49 = vmul.f32 %v2686_v38, %v1696_v48 }
0x1ff0   :  { %1700 = vrot.lane.b32.xlu1 %v1698_v49, %s2716_s3  ;;  %v1176_v49 = vadd.f32 %v3101_v53, %v3051_v55 }
0x2062   :  { %v1701_v50 = vpop.permute.xlu1 %1700 }
0x2063   :  { %1703 = vst.msk [vmem:[#allocation3 + $0x20] sm:$0xff] %vm192_vm2, %v1701_v50  ;;  %2533 = vmatmul.mubr.msk.f32.vlgmr.msra.gmra.mxu1 %vm192_vm2, %v1701_v50 }
0x2064   :  { %2547 = vmatpush3.msra.mxu1 %v2994_v42  ;;  %2554 = vmatprep.mubr.msk.f32.mxu1 %vm2714_vm1, %v2713_v6 }
0x2065   :  { %2548 = vmatprep.subr.mxu1 %v2713_v6 }
0x2066   :  { %2549 = vmatpush3.msra.mxu1 %v3000_v43 }
0x2067   :  { %2550 = vmatprep.subr.mxu1 %v2713_v6 }
0x2068   :  { %2551 = vmatpush3.msra.mxu1 %v3007_v44 }
0x2069   :  { %2552 = vmatprep.subr.mxu1 %v2713_v6 }
0x206a   :  { %2553 = vmatpush3.msra.mxu1 %v3014_v45  ;;  %v2017_v13 = vld [vmem:[#allocation3 + $0x20] sm:$0xff] }
0x2123   :  { %v1773_v14 = vpop.f32.mrf.mxu1 }
0x2124   :  { %v1777_v42 = vadd.f32 %v1773_v14, %v1166_v52 }
0x2125   :  { %v2534_v56 = vpop.f32.mrf.mxu1 }
0x2126   :  { %2689 = vtanh.f32 %v1777_v42  ;;  %v2217_v58 = vmul.f32 -1.442695, %v1777_v42 }
0x2128   :  { %2691 = vpow2.f32 %v2217_v58 }
0x2133   :  { %v2690_v57 = vpop.eup %2689 }
0x2134   :  { %1787 = vrot.lane.b32.xlu0 %v2690_v57, %s2715_s12 }
0x2135   :  { %v2692_v43 = vpop.eup %2691 }
0x2136   :  { %v1781_v4 = vadd.f32 1.0, %v2692_v43 }
0x2138   :  { %2693 = vrcp.f32 %v1781_v4 }
0x2145   :  { %v2694_v44 = vpop.eup %2693 }
0x2146   :  { %v1785_v45 = vmul.f32 %v2694_v44, %v1692_v46 }
0x21a6   :  { %v1788_v59 = vpop.permute.xlu0 %1787 }
0x21a7   :  { %v1790_v6 = vmul.f32 %v2694_v44, %v1788_v59 }
0x21a9   :  { %1792 = vrot.lane.b32.xlu1 %v1790_v6, %s2716_s3 }
0x221b   :  { %v1793_v16 = vpop.permute.xlu1 %1792 }
0x221c   :  { %v3159_v51 = vadd.f32 %v1793_v16, %v1785_v45 }
0x221e   :  { %2695 = vtanh.f32 %v3159_v51 }
0x222b   :  { %v2696_v60 = vpop.eup %2695 }
0x222c   :  { %1798 = vrot.lane.b32.xlu0 %v2696_v60, %s2715_s12 }
0x229e   :  { %v1799_v61 = vpop.permute.xlu0 %1798 }
0x229f   :  { %v1801_v62 = vmul.f32 %v2694_v44, %v1799_v61 }
0x22a1   :  { %1803 = vrot.lane.b32.xlu1 %v1801_v62, %s2716_s3 }
0x2313   :  { %v1804_v9 = vpop.permute.xlu1 %1803 }
0x2314   :  { %1806 = vst.msk [vmem:[#allocation3 + $0x28] sm:$0xff] %vm192_vm2, %v1804_v9  ;;  %2544 = vmatmul.mubr.msk.f32.vlgmr.msra.gmra.mxu0 %vm192_vm2, %v1804_v9 }
0x2315   :  { %2558 = vmatpush3.msra.mxu0 %v2024_v18  ;;  %2565 = vmatprep.mubr.msk.f32.mxu0 %vm192_vm2, %v2013_v11 }
0x2316   :  { %2559 = vmatprep.subr.mxu0 %v2023_v63 }
0x2317   :  { %2560 = vmatpush3.msra.mxu0 %v2023_v63 }
0x2318   :  { %2561 = vmatprep.subr.mxu0 %v2022_v0 }
0x2319   :  { %2562 = vmatpush3.msra.mxu0 %v2022_v0 }
0x231a   :  { %2563 = vmatprep.subr.mxu0 %v2021_v1 }
0x231b   :  { %2564 = vmatpush3.msra.mxu0 %v2021_v1  ;;  %v2018_v5 = vld [vmem:[#allocation3 + $0x28] sm:$0xff] }
0x231c   :  { %2566 = vmatmul.mubr.msk.f32.vlgmr.msra.gmra.mxu0 %vm192_vm2, %v2014_v12 }
0x231d   :  { %2568 = vmatprep.mubr.msk.f32.mxu0 %vm192_vm2, %v2015_v2 }
0x2320   :  { %2569 = vmatmul.mubr.msk.f32.gmra.mxu0 %vm192_vm2, %v2016_v3 }
0x2321   :  { %2571 = vmatprep.mubr.msk.f32.mxu0 %vm192_vm2, %v2017_v13 }
0x2324   :  { %2572 = vmatmul.mubr.msk.f32.gmra.mxu0 %vm192_vm2, %v2018_v5 }
0x23d4   :  { %v1876_v8 = vpop.f32.mrf.mxu0 }
0x23d5   :  { %v1880_v10 = vadd.f32 %v1876_v8, %v1171_v7 }
0x23d6   :  { %v2545_v15 = vpop.f32.mrf.mxu0 }
0x23d7   :  { %2697 = vtanh.f32 %v1880_v10  ;;  %v2219_v32 = vmul.f32 -1.442695, %v1880_v10 }
0x23d9   :  { %2699 = vpow2.f32 %v2219_v32 }
0x23dc   :  { %v2567_v20 = vpop.f32.mrf.mxu0 }
0x23dd   :  { %v2128_v21 = vadd.f32 %v2567_v20, %v3189_v17 }
0x23de   :  { %v2122_v22 = vpop.f32.mrf.mxu0 }
0x23df   :  { %2163 = vst.msk [vmem:[%s3256_s9 + $0x8] sm:$0xff] %vm2161_vm3, %v2128_v21  ;;  %v2123_v54 = vadd.f32 %v3189_v17, %v2122_v22 }
0x23e0   :  { %v2570_v23 = vpop.f32.mrf.mxu0 }
0x23e1   :  { %2162 = vst.msk [vmem:[%s3256_s9] sm:$0xff] %vm2161_vm3, %v2123_v54  ;;  %v2138_v24 = vadd.f32 %v2570_v23, %v3189_v17 }
0x23e2   :  { %v2132_v25 = vpop.f32.mrf.mxu0 }
0x23e3   :  { %2165 = vst.msk [vmem:[%s3256_s9 + $0x18] sm:$0xff] %vm2161_vm3, %v2138_v24  ;;  %v2133_v26 = vadd.f32 %v3189_v17, %v2132_v25 }
0x23e4   :  { %v2698_v27 = vpop.eup %2697  ;;  %v2573_v28 = vpop.f32.mrf.mxu0 }
0x23e5   :  { %2164 = vst.msk [vmem:[%s3256_s9 + $0x10] sm:$0xff] %vm2161_vm3, %v2133_v26  ;;  %v2148_v29 = vadd.f32 %v2573_v28, %v3189_v17  ;;  %1890 = vrot.lane.b32.xlu0 %v2698_v27, %s2715_s12 }
0x23e6   :  { %v2142_v30 = vpop.f32.mrf.mxu0  ;;  %v2700_v33 = vpop.eup %2699 }
0x23e7   :  { %2167 = vst.msk [vmem:[%s3256_s9 + $0x28] sm:$0xff] %vm2161_vm3, %v2148_v29  ;;  %v2143_v31 = vadd.f32 %v3189_v17, %v2142_v30  ;;  %v1884_v34 = vadd.f32 1.0, %v2700_v33 }
0x23e9   :  { %2166 = vst.msk [vmem:[%s3256_s9 + $0x20] sm:$0xff] %vm2161_vm3, %v2143_v31  ;;  %2701 = vrcp.f32 %v1884_v34 }
0x23f6   :  { %v2702_v35 = vpop.eup %2701 }
0x23f7   :  { %v1888_v38 = vmul.f32 %v2702_v35, %v3159_v51 }
0x2457   :  { %v1891_v36 = vpop.permute.xlu0 %1890 }
0x2458   :  { %v1893_v37 = vmul.f32 %v2702_v35, %v1891_v36 }
0x245a   :  { %1895 = vrot.lane.b32.xlu1 %v1893_v37, %s2716_s3 }
0x24cc   :  { %v1896_v39 = vpop.permute.xlu1 %1895 }
0x24cd   :  { %v1898_v40 = vadd.f32 %v1896_v39, %v1888_v38 }
0x24cf   :  { %2703 = vtanh.f32 %v1898_v40 }
0x24dc   :  { %v2704_v19 = vpop.eup %2703 }
0x24dd   :  { %1901 = vrot.lane.b32.xlu0 %v2704_v19, %s2715_s12 }
0x254f   :  { %v1902_v41 = vpop.permute.xlu0 %1901 }
0x2550   :  { %v1904_v46 = vmul.f32 %v2702_v35, %v1902_v41 }
0x2552   :  { %1906 = vrot.lane.b32.xlu1 %v1904_v46, %s2716_s3 }
0x25c4   :  { %v1907_v47 = vpop.permute.xlu1 %1906 }
0x25c5   :  { %1909 = vst.msk [vmem:[#allocation3 + $0x30] sm:$0xff] %vm192_vm2, %v1907_v47  ;;  %2555 = vmatmul.mubr.msk.f32.vlgmr.msra.gmra.mxu1 %vm192_vm2, %v1907_v47 }
0x25cc   :  { %v2019_v48 = vld [vmem:[#allocation3 + $0x30] sm:$0xff] }
0x25cd   :  { %2574 = vmatprep.mubr.msk.f32.mxu0 %vm192_vm2, %v2019_v48 }
0x2685   :  { %v1979_v50 = vpop.f32.mrf.mxu1 }
0x2686   :  { %v1983_v52 = vadd.f32 %v1979_v50, %v1176_v49 }
0x2687   :  { %v2556_v14 = vpop.f32.mrf.mxu1 }
0x2688   :  { %2705 = vtanh.f32 %v1983_v52  ;;  %v2221_v56 = vmul.f32 -1.442695, %v1983_v52 }
0x268a   :  { %2707 = vpow2.f32 %v2221_v56 }
0x2695   :  { %v2706_v42 = vpop.eup %2705 }
0x2696   :  { %1993 = vrot.lane.b32.xlu0 %v2706_v42, %s2715_s12 }
0x2697   :  { %v2708_v57 = vpop.eup %2707 }
0x2698   :  { %v1987_v58 = vadd.f32 1.0, %v2708_v57 }
0x269a   :  { %2709 = vrcp.f32 %v1987_v58 }
0x26a7   :  { %v2710_v43 = vpop.eup %2709 }
0x26a8   :  { %v1991_v59 = vmul.f32 %v2710_v43, %v1898_v40 }
0x2708   :  { %v1994_v4 = vpop.permute.xlu0 %1993 }
0x2709   :  { %v1996_v44 = vmul.f32 %v2710_v43, %v1994_v4 }
0x270b   :  { %1998 = vrot.lane.b32.xlu1 %v1996_v44, %s2716_s3 }
0x277d   :  { %v1999_v6 = vpop.permute.xlu1 %1998 }
0x277e   :  { %v2001_v55 = vadd.f32 %v1999_v6, %v1991_v59 }
0x2780   :  { %2711 = vtanh.f32 %v2001_v55 }
0x278d   :  { %v2712_v53 = vpop.eup %2711 }
0x278e   :  { %2004 = vrot.lane.b32.xlu0 %v2712_v53, %s2715_s12 }
0x2800   :  { %v2005_v45 = vpop.permute.xlu0 %2004 }
0x2801   :  { %v2007_v16 = vmul.f32 %v2710_v43, %v2005_v45 }
0x2803   :  { %2009 = vrot.lane.b32.xlu1 %v2007_v16, %s2716_s3 }
0x2875   :  { %v2010_v51 = vpop.permute.xlu1 %2009 }
0x2876   :  { %2012 = vst.msk [vmem:[#allocation3 + $0x38] sm:$0xff] %vm192_vm2, %v2010_v51 }
0x287d   :  { %v2020_v18 = vld [vmem:[#allocation3 + $0x38] sm:$0xff] }
0x287e   :  { %2575 = vmatmul.mubr.msk.f32.gmra.mxu0 %vm192_vm2, %v2020_v18 }
0x293e   :  { %v2576_v60 = vpop.f32.mrf.mxu0 }
0x293f   :  { %v2158_v61 = vadd.f32 %v2576_v60, %v3189_v17 }
0x2940   :  { %v2152_v62 = vpop.f32.mrf.mxu0 }
0x2941   :  { %2169 = vst.msk [vmem:[%s3256_s9 + $0x38] sm:$0xff] %vm2161_vm3, %v2158_v61  ;;  %v2153_v9 = vadd.f32 %v3189_v17, %v2152_v62 }
0x2943   :  { %2168 = vst.msk [vmem:[%s3256_s9 + $0x30] sm:$0xff] %vm2161_vm3, %v2153_v9 }

</bundles_post_ra>
